<compile_context>
chip_gen: v6e
topology: v6e:2x2x1
jax: 0.10.0
libtpu: 0.0.40
codegen_flags: <defaults>
</compile_context>

<pallas_src>
import functools

import jax
import jax.numpy as jnp
from jax.experimental import pallas as pl
from jax.experimental.pallas import tpu as pltpu


def _round_up(x: int, m: int) -> int:
    return (x + m - 1) // m * m


def autoencoder_kernel(x_ref,
                       w1_ref, b1_ref,
                       w2_ref, b2_ref,
                       w3_ref, b3_ref,
                       w4_ref, b4_ref,
                       enc_ref, dec_ref,
                       *, enc_dim: int):
    """Whole encoder+decoder on one batch tile: bf16 MXU operands, f32 everywhere else."""
    # Hoist the (1, N) bias reads once (JAX does not CSE broadcast_in_dim).
    b1 = b1_ref[...]
    b2 = b2_ref[...]
    b3 = b3_ref[...]
    b4 = b4_ref[...]

    x = x_ref[...].astype(jnp.bfloat16)   # no-op if the caller already passed bf16

    # Encoder: Linear(input_dim -> 256) + ReLU
    h1 = jnp.dot(x, w1_ref[...], preferred_element_type=jnp.float32) + b1
    h1 = jnp.maximum(h1, 0.0)

    # Encoder: Linear(256 -> enc_pad) + Sigmoid (columns >= enc_dim are padding)
    z = jnp.dot(h1.astype(jnp.bfloat16), w2_ref[...],
                preferred_element_type=jnp.float32) + b2
    enc = jax.nn.sigmoid(z)
    # Zero the lane-padding columns (sigmoid(0) = 0.5 otherwise) so the padded block is
    # safe to expose directly.  W3's padded rows are zero, so decoded is unaffected.
    lane = jax.lax.broadcasted_iota(jnp.int32, enc.shape, 1)
    enc = jnp.where(lane < enc_dim, enc, 0.0)

    # Decoder: Linear(enc_pad -> 256) + ReLU
    h2 = jnp.dot(enc.astype(jnp.bfloat16), w3_ref[...],
                 preferred_element_type=jnp.float32) + b3
    h2 = jnp.maximum(h2, 0.0)

    # Decoder: Linear(256 -> input_dim), no activation
    dec = jnp.dot(h2.astype(jnp.bfloat16), w4_ref[...],
                  preferred_element_type=jnp.float32) + b4

    enc_ref[...] = enc.astype(enc_ref.dtype)   # lane-dense (tile, 128k) store
    dec_ref[...] = dec.astype(dec_ref.dtype)   # lane-dense (tile, input_dim) store


def _pick_batch_tile(B: int, batch_tile: int) -> int:
    """Batch tile: big (amortize per-step overhead) but with enough grid steps for v7x."""
    bt = max(16, min(_round_up(batch_tile, 16), _round_up(B, 16)))
    # Target >= 4 grid steps (>= 2 per v7x TensorCore so each core double-buffers its
    # tile DMA), but never shrink below 256 rows: on single-TC v5e/v6e smaller tiles
    # only add per-step overhead without buying any extra overlap.
    if pl.cdiv(B, bt) < 4:
        cand4 = _round_up(pl.cdiv(B, 4), 16)
        cand2 = _round_up(pl.cdiv(B, 2), 16)
        if cand4 >= 256:
            bt = min(bt, cand4)
        elif pl.cdiv(B, bt) < 2 and cand2 >= 256:
            bt = min(bt, cand2)
    return bt


def document_autoencoder(x, params, *, batch_tile: int = 1024,
                         vmem_limit_bytes: int = 32 * 1024 * 1024,
                         return_padded_encoding: bool = False):
    """DocumentAutoencoder forward pass via a single pallas_call.

    x: (B, input_dim) float32 or bfloat16 (bf16 halves the largest HBM read).
    params: dict with f32 w1..w4 stored as (in, out) and b1..b4 stored as (1, out).
    Returns (encoded, decoded), both float32:
      encoded: (B, encoding_dim), or (B, 128-padded) with zero pad columns if
               return_padded_encoding=True (skips one wrapper-side copy pass).
      decoded: (B, input_dim)
    """
    B, input_dim = x.shape
    hidden = params["w1"].shape[1]          # 256
    enc_dim = params["w2"].shape[1]         # 32
    assert params["w4"].shape[1] == input_dim

    # Lane-dense padding of the encoding dimension (32 -> 128).
    enc_pad = _round_up(enc_dim, 128)

    bt = _pick_batch_tile(B, batch_tile)

    # VMEM budget: double-buffered batch tiles + resident weights must fit v7x's 64 MiB
    # (keep <= ~48 MiB).  Shrink bt only if input_dim grows well past the default 768.
    x_itemsize = jnp.dtype(x.dtype).itemsize
    weight_bytes = (2 * (input_dim * hidden + hidden * enc_pad
                         + enc_pad * hidden + hidden * input_dim)      # bf16 weights
                    + 4 * (hidden + enc_pad + hidden + input_dim))     # f32 biases

    def tile_bytes(t):
        return 2 * (t * input_dim * x_itemsize        # x tile (double-buffered)
                    + t * input_dim * 4               # decoded tile
                    + t * enc_pad * 4)                # encoded tile

    while bt > 256 and tile_bytes(bt) + 2 * weight_bytes > 48 * 1024 * 1024:
        bt = max(256, _round_up(bt // 2, 16))
    vmem_limit = int(min(max(vmem_limit_bytes,
                             tile_bytes(bt) + 2 * weight_bytes + (2 << 20)),
                         64 * 1024 * 1024))

    # Pack params: bf16 weights (MXU-native, half the DMA bytes), f32 biases,
    # zero-padded W2/b2 columns and W3 rows for the 128-lane encoding.
    bf16, f32 = jnp.bfloat16, jnp.float32
    w1 = params["w1"].astype(bf16)
    b1 = params["b1"].astype(f32)
    w2 = jnp.zeros((hidden, enc_pad), bf16).at[:, :enc_dim].set(params["w2"].astype(bf16))
    b2 = jnp.zeros((1, enc_pad), f32).at[:, :enc_dim].set(params["b2"].astype(f32))
    w3 = jnp.zeros((enc_pad, hidden), bf16).at[:enc_dim, :].set(params["w3"].astype(bf16))
    b3 = params["b3"].astype(f32)
    w4 = params["w4"].astype(bf16)
    b4 = params["b4"].astype(f32)

    # Weight / bias blocks are the full (small) arrays and stay resident in VMEM;
    # only the batch axis of x / encoded / decoded is tiled across the grid.  The grid
    # uses cdiv so ragged batches get a masked partial last block (no pad pass in HBM).
    full = lambda shape: pl.BlockSpec(shape, lambda i: (0, 0))
    grid = pl.cdiv(B, bt)

    grid_spec = pltpu.PrefetchScalarGridSpec(
        num_scalar_prefetch=0,
        grid=(grid,),
        in_specs=[
            pl.BlockSpec((bt, input_dim), lambda i: (i, 0)),          # x
            full((input_dim, hidden)),  full((1, hidden)),            # W1, b1
            full((hidden, enc_pad)),    full((1, enc_pad)),           # W2, b2 (padded)
            full((enc_pad, hidden)),    full((1, hidden)),            # W3, b3 (padded)
            full((hidden, input_dim)),  full((1, input_dim)),         # W4, b4
        ],
        out_specs=[
            pl.BlockSpec((bt, enc_pad), lambda i: (i, 0)),            # encoded (padded)
            pl.BlockSpec((bt, input_dim), lambda i: (i, 0)),          # decoded
        ],
    )

    flops = 2 * B * (input_dim * hidden + hidden * enc_pad
                     + enc_pad * hidden + hidden * input_dim)
    bytes_accessed = (B * (input_dim * x_itemsize + enc_pad * 4 + input_dim * 4)
                      + weight_bytes)
    cost = pl.CostEstimate(flops=flops, transcendentals=B * enc_pad,
                           bytes_accessed=bytes_accessed)

    enc_p, dec = pl.pallas_call(
        functools.partial(autoencoder_kernel, enc_dim=enc_dim),
        out_shape=(
            jax.ShapeDtypeStruct((B, enc_pad), jnp.float32),     # dtype pinned: f32
            jax.ShapeDtypeStruct((B, input_dim), jnp.float32),   # even if x is bf16
        ),
        grid_spec=grid_spec,
        compiler_params=pltpu.CompilerParams(
            dimension_semantics=("parallel",),
            vmem_limit_bytes=vmem_limit),
        cost_estimate=cost,
    )(x, w1, b1, w2, b2, w3, b3, w4, b4)

    if return_padded_encoding:
        return enc_p, dec          # padded columns >= enc_dim are exactly 0
    return enc_p[:, :enc_dim], dec


def init_params(key, input_dim=768, encoding_dim=32, hidden=256):
    """Deterministic init mimicking PyTorch nn.Linear (U[-1/sqrt(fan_in), +])."""
    def linear(k, fan_in, fan_out):
        kw, kb = jax.random.split(k)
        bound = 1.0 / jnp.sqrt(fan_in)
        w = jax.random.uniform(kw, (fan_in, fan_out), jnp.float32, -bound, bound)
        b = jax.random.uniform(kb, (1, fan_out), jnp.float32, -bound, bound)
        return w, b

    k1, k2, k3, k4 = jax.random.split(key, 4)
    w1, b1 = linear(k1, input_dim, hidden)
    w2, b2 = linear(k2, hidden, encoding_dim)
    w3, b3 = linear(k3, encoding_dim, hidden)
    w4, b4 = linear(k4, hidden, input_dim)
    return dict(w1=w1, b1=b1, w2=w2, b2=b2, w3=w3, b3=b3, w4=w4, b4=b4)


def reference_forward_bf16(x, p):
    """Pure-JAX reference with the same bf16-operand / f32-accumulate matmuls."""
    def mm(a, w):
        return jnp.dot(a.astype(jnp.bfloat16), w.astype(jnp.bfloat16),
                       preferred_element_type=jnp.float32)
    h1 = jnp.maximum(mm(x, p["w1"]) + p["b1"], 0.0)
    enc = jax.nn.sigmoid(mm(h1, p["w2"]) + p["b2"])
    h2 = jnp.maximum(mm(enc, p["w3"]) + p["b3"], 0.0)
    dec = mm(h2, p["w4"]) + p["b4"]
    return enc, dec


def reference_forward_f32(x, p):
    """Pure-f32 reference matching the original PyTorch module semantics."""
    h1 = jnp.maximum(x @ p["w1"] + p["b1"], 0.0)
    enc = jax.nn.sigmoid(h1 @ p["w2"] + p["b2"])
    h2 = jnp.maximum(enc @ p["w3"] + p["b3"], 0.0)
    dec = h2 @ p["w4"] + p["b4"]
    return enc, dec


if __name__ == "__main__":
    INPUT_DIM = 768      # BERT embedding dim (module default)
    ENC_DIM = 32
    BATCH = 40           # not a tile multiple: exercises the masked partial last block

    key = jax.random.PRNGKey(0)
    k_x, k_p = jax.random.split(key)
    x = jax.random.normal(k_x, (BATCH, INPUT_DIM), jnp.float32)
    params = init_params(k_p, INPUT_DIM, ENC_DIM)

    # Small tile here so the test runs a multi-step "parallel" grid with a ragged tail;
    # production callers should keep the default batch_tile=1024.
    encoded, decoded = document_autoencoder(x, params, batch_tile=16)
    jax.block_until_ready((encoded, decoded))

    assert encoded.shape == (BATCH, ENC_DIM)
    assert decoded.shape == (BATCH, INPUT_DIM)

    # Exact-math reference (same bf16 operand quantization, f32 accumulate).
    enc_ref, dec_ref = reference_forward_bf16(x, params)
    assert jnp.allclose(encoded, enc_ref, atol=1e-4, rtol=1e-4)
    assert jnp.allclose(decoded, dec_ref, atol=1e-3, rtol=1e-3)

    # Loose sanity check against the pure-f32 module semantics (bf16 precision tradeoff).
    enc_f32, dec_f32 = reference_forward_f32(x, params)
    assert jnp.allclose(encoded, enc_f32, atol=5e-2)
    assert jnp.allclose(decoded, dec_f32, atol=5e-2)

    # bf16-x fast path (halves the biggest HBM read); outputs stay pinned to f32, and the
    # padded-encoding output has exact zeros in columns >= ENC_DIM.
    enc_pad, dec_b = document_autoencoder(x.astype(jnp.bfloat16), params,
                                          return_padded_encoding=True)
    jax.block_until_ready((enc_pad, dec_b))
    assert enc_pad.dtype == jnp.float32 and dec_b.dtype == jnp.float32
    assert enc_pad.shape == (BATCH, 128)
    assert jnp.all(enc_pad[:, ENC_DIM:] == 0.0)
    assert jnp.allclose(enc_pad[:, :ENC_DIM], enc_ref, atol=1e-2)
    assert jnp.allclose(dec_b, dec_ref, atol=5e-2)

    print("KERNEL_OK")
</pallas_src>

<mosaic_0001>
module attributes {stable_mosaic.version = 11 : i64} {
  func.func @autoencoder_kernel(%arg0: i32, %arg1: memref<16x768xf32, #tpu.memory_space<vmem>>, %arg2: memref<768x256xbf16, #tpu.memory_space<vmem>>, %arg3: memref<1x256xf32, #tpu.memory_space<vmem>>, %arg4: memref<256x128xbf16, #tpu.memory_space<vmem>>, %arg5: memref<1x128xf32, #tpu.memory_space<vmem>>, %arg6: memref<128x256xbf16, #tpu.memory_space<vmem>>, %arg7: memref<1x256xf32, #tpu.memory_space<vmem>>, %arg8: memref<256x768xbf16, #tpu.memory_space<vmem>>, %arg9: memref<1x768xf32, #tpu.memory_space<vmem>>, %arg10: memref<16x128xf32, #tpu.memory_space<vmem>>, %arg11: memref<16x768xf32, #tpu.memory_space<vmem>>) attributes {dimension_semantics = [#tpu.dimension_semantics<parallel>], iteration_bounds = array<i64: 3>, scalar_prefetch = 0 : i64, scratch_operands = 0 : i64, tpu.core_type = #tpu.core_type<tc>, window_params = [{transform_indices = @transform_0, window_bounds = array<i64: 16, 768>}, {pipeline_mode = #tpu.pipeline_mode<synchronous>, transform_indices = @transform_1, window_bounds = array<i64: 768, 256>}, {pipeline_mode = #tpu.pipeline_mode<synchronous>, transform_indices = @transform_2, window_bounds = array<i64: 1, 256>}, {pipeline_mode = #tpu.pipeline_mode<synchronous>, transform_indices = @transform_3, window_bounds = array<i64: 256, 128>}, {pipeline_mode = #tpu.pipeline_mode<synchronous>, transform_indices = @transform_4, window_bounds = array<i64: 1, 128>}, {pipeline_mode = #tpu.pipeline_mode<synchronous>, transform_indices = @transform_5, window_bounds = array<i64: 128, 256>}, {pipeline_mode = #tpu.pipeline_mode<synchronous>, transform_indices = @transform_6, window_bounds = array<i64: 1, 256>}, {pipeline_mode = #tpu.pipeline_mode<synchronous>, transform_indices = @transform_7, window_bounds = array<i64: 256, 768>}, {pipeline_mode = #tpu.pipeline_mode<synchronous>, transform_indices = @transform_8, window_bounds = array<i64: 1, 768>}, {transform_indices = @transform_9, window_bounds = array<i64: 16, 128>}, {transform_indices = @transform_10, window_bounds = array<i64: 16, 768>}]} {
    %c0 = arith.constant 0 : index
    %c0_0 = arith.constant 0 : index
    %0 = vector.load %arg3[%c0, %c0_0] : memref<1x256xf32, #tpu.memory_space<vmem>>, vector<1x256xf32>
    %c0_1 = arith.constant 0 : index
    %c0_2 = arith.constant 0 : index
    %1 = vector.load %arg5[%c0_1, %c0_2] : memref<1x128xf32, #tpu.memory_space<vmem>>, vector<1x128xf32>
    %c0_3 = arith.constant 0 : index
    %c0_4 = arith.constant 0 : index
    %2 = vector.load %arg7[%c0_3, %c0_4] : memref<1x256xf32, #tpu.memory_space<vmem>>, vector<1x256xf32>
    %c0_5 = arith.constant 0 : index
    %c0_6 = arith.constant 0 : index
    %3 = vector.load %arg9[%c0_5, %c0_6] : memref<1x768xf32, #tpu.memory_space<vmem>>, vector<1x768xf32>
    %c0_7 = arith.constant 0 : index
    %c0_8 = arith.constant 0 : index
    %4 = vector.load %arg1[%c0_7, %c0_8] : memref<16x768xf32, #tpu.memory_space<vmem>>, vector<16x768xf32>
    %5 = arith.truncf %4 : vector<16x768xf32> to vector<16x768xbf16>
    %c0_9 = arith.constant 0 : index
    %c0_10 = arith.constant 0 : index
    %6 = vector.load %arg2[%c0_9, %c0_10] : memref<768x256xbf16, #tpu.memory_space<vmem>>, vector<768x256xbf16>
    %cst = arith.constant dense<0.000000e+00> : vector<16x256xf32>
    %7 = tpu.matmul %5, %6, %cst {dimension_numbers = #tpu.dot_dimension_numbers<[1], [0], [0], [1], [0, 0, 1, 1], [], []>} : vector<16x768xbf16>, vector<768x256xbf16>, vector<16x256xf32> -> vector<16x256xf32>
    %8 = vector.broadcast %0 : vector<1x256xf32> to vector<16x256xf32>
    %9 = arith.addf %7, %8 : vector<16x256xf32>
    %cst_11 = arith.constant 0.000000e+00 : f32
    %10 = vector.broadcast %cst_11 : f32 to vector<16x256xf32>
    %11 = arith.maximumf %9, %10 : vector<16x256xf32>
    %12 = arith.truncf %11 : vector<16x256xf32> to vector<16x256xbf16>
    %c0_12 = arith.constant 0 : index
    %c0_13 = arith.constant 0 : index
    %13 = vector.load %arg4[%c0_12, %c0_13] : memref<256x128xbf16, #tpu.memory_space<vmem>>, vector<256x128xbf16>
    %cst_14 = arith.constant dense<0.000000e+00> : vector<16x128xf32>
    %14 = tpu.matmul %12, %13, %cst_14 {dimension_numbers = #tpu.dot_dimension_numbers<[1], [0], [0], [1], [0, 0, 1, 1], [], []>} : vector<16x256xbf16>, vector<256x128xbf16>, vector<16x128xf32> -> vector<16x128xf32>
    %15 = vector.broadcast %1 : vector<1x128xf32> to vector<16x128xf32>
    %16 = arith.addf %14, %15 : vector<16x128xf32>
    %17 = arith.negf %16 : vector<16x128xf32>
    %18 = math.exp %17 : vector<16x128xf32>
    %cst_15 = arith.constant 1.000000e+00 : f32
    %19 = vector.broadcast %cst_15 : f32 to vector<16x128xf32>
    %20 = arith.addf %19, %18 : vector<16x128xf32>
    %21 = arith.divf %19, %20 : vector<16x128xf32>
    %22 = tpu.iota {dimensions = array<i32: 1>} : vector<16x128xi32>
    %c32_i32 = arith.constant 32 : i32
    %23 = vector.broadcast %c32_i32 : i32 to vector<16x128xi32>
    %24 = arith.cmpi slt, %22, %23 : vector<16x128xi32>
    %cst_16 = arith.constant 0.000000e+00 : f32
    %25 = vector.broadcast %cst_16 : f32 to vector<16x128xf32>
    %26 = arith.select %24, %21, %25 : vector<16x128xi1>, vector<16x128xf32>
    %27 = arith.truncf %26 : vector<16x128xf32> to vector<16x128xbf16>
    %c0_17 = arith.constant 0 : index
    %c0_18 = arith.constant 0 : index
    %28 = vector.load %arg6[%c0_17, %c0_18] : memref<128x256xbf16, #tpu.memory_space<vmem>>, vector<128x256xbf16>
    %cst_19 = arith.constant dense<0.000000e+00> : vector<16x256xf32>
    %29 = tpu.matmul %27, %28, %cst_19 {dimension_numbers = #tpu.dot_dimension_numbers<[1], [0], [0], [1], [0, 0, 1, 1], [], []>} : vector<16x128xbf16>, vector<128x256xbf16>, vector<16x256xf32> -> vector<16x256xf32>
    %30 = vector.broadcast %2 : vector<1x256xf32> to vector<16x256xf32>
    %31 = arith.addf %29, %30 : vector<16x256xf32>
    %cst_20 = arith.constant 0.000000e+00 : f32
    %32 = vector.broadcast %cst_20 : f32 to vector<16x256xf32>
    %33 = arith.maximumf %31, %32 : vector<16x256xf32>
    %34 = arith.truncf %33 : vector<16x256xf32> to vector<16x256xbf16>
    %c0_21 = arith.constant 0 : index
    %c0_22 = arith.constant 0 : index
    %35 = vector.load %arg8[%c0_21, %c0_22] : memref<256x768xbf16, #tpu.memory_space<vmem>>, vector<256x768xbf16>
    %cst_23 = arith.constant dense<0.000000e+00> : vector<16x768xf32>
    %36 = tpu.matmul %34, %35, %cst_23 {dimension_numbers = #tpu.dot_dimension_numbers<[1], [0], [0], [1], [0, 0, 1, 1], [], []>} : vector<16x256xbf16>, vector<256x768xbf16>, vector<16x768xf32> -> vector<16x768xf32>
    %37 = vector.broadcast %3 : vector<1x768xf32> to vector<16x768xf32>
    %38 = arith.addf %36, %37 : vector<16x768xf32>
    %c0_24 = arith.constant 0 : index
    %c0_25 = arith.constant 0 : index
    %39 = vector.load %arg10[%c0_24, %c0_25] : memref<16x128xf32, #tpu.memory_space<vmem>>, vector<16x128xf32>
    tpu.vector_store %arg10[%c0_24, %c0_25], %26 {strides = array<i32>} : memref<16x128xf32, #tpu.memory_space<vmem>>, vector<16x128xf32>,
    %c0_26 = arith.constant 0 : index
    %c0_27 = arith.constant 0 : index
    %40 = vector.load %arg11[%c0_26, %c0_27] : memref<16x768xf32, #tpu.memory_space<vmem>>, vector<16x768xf32>
    tpu.vector_store %arg11[%c0_26, %c0_27], %38 {strides = array<i32>} : memref<16x768xf32, #tpu.memory_space<vmem>>, vector<16x768xf32>,
    return
  }
  func.func @transform_0(%arg0: i32) -> (i32, i32) {
    %c0_i32 = arith.constant 0 : i32
    %c0_i32_0 = arith.constant 0 : i32
    return %arg0, %c0_i32 : i32, i32
  }
  func.func @transform_1(%arg0: i32) -> (i32, i32) {
    %c0_i32 = arith.constant 0 : i32
    %c0_i32_0 = arith.constant 0 : i32
    %c0_i32_1 = arith.constant 0 : i32
    return %c0_i32, %c0_i32_0 : i32, i32
  }
  func.func @transform_2(%arg0: i32) -> (i32, i32) {
    %c0_i32 = arith.constant 0 : i32
    %c0_i32_0 = arith.constant 0 : i32
    %c0_i32_1 = arith.constant 0 : i32
    return %c0_i32, %c0_i32_0 : i32, i32
  }
  func.func @transform_3(%arg0: i32) -> (i32, i32) {
    %c0_i32 = arith.constant 0 : i32
    %c0_i32_0 = arith.constant 0 : i32
    %c0_i32_1 = arith.constant 0 : i32
    return %c0_i32, %c0_i32_0 : i32, i32
  }
  func.func @transform_4(%arg0: i32) -> (i32, i32) {
    %c0_i32 = arith.constant 0 : i32
    %c0_i32_0 = arith.constant 0 : i32
    %c0_i32_1 = arith.constant 0 : i32
    return %c0_i32, %c0_i32_0 : i32, i32
  }
  func.func @transform_5(%arg0: i32) -> (i32, i32) {
    %c0_i32 = arith.constant 0 : i32
    %c0_i32_0 = arith.constant 0 : i32
    %c0_i32_1 = arith.constant 0 : i32
    return %c0_i32, %c0_i32_0 : i32, i32
  }
  func.func @transform_6(%arg0: i32) -> (i32, i32) {
    %c0_i32 = arith.constant 0 : i32
    %c0_i32_0 = arith.constant 0 : i32
    %c0_i32_1 = arith.constant 0 : i32
    return %c0_i32, %c0_i32_0 : i32, i32
  }
  func.func @transform_7(%arg0: i32) -> (i32, i32) {
    %c0_i32 = arith.constant 0 : i32
    %c0_i32_0 = arith.constant 0 : i32
    %c0_i32_1 = arith.constant 0 : i32
    return %c0_i32, %c0_i32_0 : i32, i32
  }
  func.func @transform_8(%arg0: i32) -> (i32, i32) {
    %c0_i32 = arith.constant 0 : i32
    %c0_i32_0 = arith.constant 0 : i32
    %c0_i32_1 = arith.constant 0 : i32
    return %c0_i32, %c0_i32_0 : i32, i32
  }
  func.func @transform_9(%arg0: i32) -> (i32, i32) {
    %c0_i32 = arith.constant 0 : i32
    %c0_i32_0 = arith.constant 0 : i32
    return %arg0, %c0_i32 : i32, i32
  }
  func.func @transform_10(%arg0: i32) -> (i32, i32) {
    %c0_i32 = arith.constant 0 : i32
    %c0_i32_0 = arith.constant 0 : i32
    return %arg0, %c0_i32 : i32, i32
  }
}

</mosaic_0001>

<bundles_post_ra>
// kernel: tpu_custom_call.1
= control target key start
LH: loop header
LB: loop body
LE: loop exit
PB: predicated region body
PF: predicated region fallthrough
CT: control target
= control target key end

     0   :  { %s3891_s0 = inlined_call_operand.hbm [shape: f32[40,768], index: 0, kind: input, shape index: {}]   ;;  %s3892_s1 = inlined_call_operand.hbm [shape: bf16[768,256], index: 1, kind: input, shape index: {}]   ;;  %s3893_s2 = inlined_call_operand.vmem [shape: f32[1,256], index: 2, kind: input, shape index: {}]   ;;  %s3894_s3 = inlined_call_operand.hbm [shape: bf16[256,128], index: 3, kind: input, shape index: {}]   ;;  %s3895_s4 = inlined_call_operand.vmem [shape: f32[1,128], index: 4, kind: input, shape index: {}]   ;;  %s3896_s5 = inlined_call_operand.hbm [shape: bf16[128,256], index: 5, kind: input, shape index: {}]   ;;  %s3897_s6 = inlined_call_operand.vmem [shape: f32[1,256], index: 6, kind: input, shape index: {}]   ;;  %s3898_s7 = inlined_call_operand.hbm [shape: bf16[256,768], index: 7, kind: input, shape index: {}]   ;;  %s3899_s8 = inlined_call_operand.vmem [shape: f32[1,768], index: 8, kind: input, shape index: {}]   ;;  %s3900_s9 = inlined_call_operand.hbm [shape: f32[40,128], index: 9, kind: output, shape index: {0}]   ;;  %s3901_s10 = inlined_call_operand.hbm [shape: f32[40,768], index: 10, kind: output, shape index: {1}]  }
   0x1   :  { %3906 = sst [smem:[#allocation21_spill]] %s3892_s1 }
   0x2   :  { %3907 = sst [smem:[#allocation22_spill]] %s3894_s3 }
   0x3   :  { %16 = vsyncpa [#allocation3], 0 }
   0x4   :  { %18 = vsyncpa [#allocation3 + $0x1], 0 }
   0x5   :  { %19 = vsyncpa [#allocation6], 0 }
   0x6   :  { %20 = vsyncpa [#allocation9], 0 }
   0x7   :  { %21 = vsyncpa [#allocation4], 0 }
   0x8   :  { %23 = vsyncpa [#allocation4 + $0x1], 0 }
   0x9   :  { %24 = vsyncpa [#allocation13], 0 }
   0xa   :  { %26 = vsyncpa [#allocation13 + $0x1], 0  ;;  %s3543_s13 = smov 0   ;;  %s3545_s14 = smov 0  }
   0xb   :  { %s3547_s15 = smov 0   ;;  %s3549_s16 = smov 0  }
   0xc LB: > { %s3564_s17 = sadd.s32 4294967295, %s3466_s16   ;;  %s2508_s18 = sadd.s32 4294967294, %s3466_s16   ;;  %s3466_s16 = sphi %s3549_s16, %s3926_s16   ;;  %s3462_s15 = sphi %s3547_s15, %s3930_s15   ;;  %s3458_s14 = sphi %s3545_s14, %s3929_s14   ;;  %s3454_s13 = sphi %s3543_s13, %s3928_s13  }
   0xd   : > { %s3568_s19 = sadd.s32 1, %s3466_s16   ;;  %s39_s20 = sadd.s32 1, %s3462_s15 }
   0xe   : > { %3908 = sst [smem:[#allocation19_spill]] %s3568_s19  ;;  %s36_s21 = ssub.s32 %s3466_s16, %s3568_s19 }
   0xf   : > { %p46_p0 = scmp.ne.s32.totalorder %s3462_s15, %s3458_s14  ;;  %p37_p1 = scmp.eq.s32.totalorder %s36_s21, 0 }
  0x10   : > { %p47_p2 = scmp.eq.s32.totalorder %s3466_s16, 0  ;;  %p52_p3 = scmp.ne.s32.totalorder %s3458_s14, %s3454_s13 }
  0x11   : > { %p3902_p4 = scmp.eq.s32.totalorder %s3564_s17, 0  ;;  %p244_p7 = scmp.eq.s32.totalorder %s3564_s17, 2 }
  0x12   : > { %s3580_s22 = scalar_select %p37_p1, %s3462_s15, %s39_s20  }
  0x13   : > { %p3582_p5 = por %p47_p2, %p46_p0  ;;  %p3588_p6 = por %p3902_p4, %p52_p3 }
  0x14   : > { %3909 = sst [smem:[#allocation20_spill]] %s3580_s22  ;;  %p250_p8 = scmp.eq.s32.totalorder %s2508_s18, 2 }
  0x15   : > { %s3911_s24 = scalar_select %p3588_p6, 1, 0 }
  0x16   : > { %p2509_p9 = scmp.ge.s32.totalorder %s3466_s16, 1  ;;  %p283_p10 = scmp.lt.s32.totalorder %s3466_s16, 4 }
  0x17   : > { %p3595_p11 = por %p244_p7, %p46_p0  ;;  %p3599_p12 = por %p250_p8, %p52_p3 }
  0x18   : > { %p3603_p13 = pnand %p2509_p9, %p283_p10  ;;  %s3468_s28 = smov [#allocation5]  }
  0x19   : > { %s3912_s25 = scalar_select %p3595_p11, 1, 0 }
  0x1a   : > { %s3913_s26 = scalar_select %p3599_p12, 1, 0 }
  0x1b   : > { %p2820_p1 = pneg %p3603_p13  ;;  %s295_s29 = sshll.u32 %s3468_s28, 4  ;;  %s296_s29 = int_to_ptr.vmem [resolvable:$true] %s295_s29 }
  0x1c   : > { %s3469_s11 = smov [#allocation8]   ;;  %s3245_s18 = scalar_lea.vmem %s296_s29, 12288 }
  0x1d   : > { %p3611_p2 = pnand %p2820_p1, %p3902_p4  ;;  %s327_s12 = sshll.u32 %s3469_s11, 4  ;;  %s328_s12 = int_to_ptr.vmem [resolvable:$true] %s327_s12 }
  0x1e   : > { %p3246_p3 = scmp.ne.s32.totalorder %s296_s29, %s3245_s18  ;;  %p3253_p9 = scmp.lt.s32.totalorder %s296_s29, %s296_s29 }
  0x1f   : > { %p3236_p0 = pneg %p3611_p2  ;;  %p3254_p10 = scmp.lt.s32.totalorder %s3245_s18, %s3245_s18 }
  0x21   : > { %p3248_p7 = pnand %p3246_p3, %p3236_p0  ;;  %p3255_p12 = por %p3254_p10, %p3253_p9 }
  0x23   : > { %p3249_p8 = pneg %p3248_p7 }
  0x25   : > { %p3256_p1 = pnand %p3255_p12, %p3249_p8 }
  0x27   : > { %3259 = shalt.err (!%p3256_p1)
}
  0x28   : > { %s3470_s20 = smov 128   ;;  %s3471_s21 = smov 8  }
  0x29   : > { %s3916_s1 = sld [smem:[#allocation21_spill]]  ;;  %s3271_s22 = scalar_lea.vmem %s328_s12, 2048 }
  0x2a   : > { %p3272_p4 = scmp.ne.s32.totalorder %s328_s12, %s3271_s22  ;;  %p3279_p11 = scmp.lt.s32.totalorder %s328_s12, %s328_s12 }
  0x2b   : > { %p3280_p6 = scmp.lt.s32.totalorder %s3271_s22, %s3271_s22 }
  0x2c   : > { %p3274_p3 = pnand %p3272_p4, %p3236_p0 }
  0x2d   : > { %p3281_p9 = por %p3280_p6, %p3279_p11 }
  0x2e   : > { %p3275_p7 = pneg %p3274_p3 }
  0x2f   : > { %2823 = dma.hbm_to_vmem [thread:$0]  (!%p3611_p2), %s3916_s1, 12288, %s296_s29, [#allocation6], %s3470_s20, %s3470_s20, %s3471_s21  }
  0x30   : > { %p3282_p12 = pnand %p3281_p9, %p3275_p7 }
  0x32   : > { %3285 = shalt.err (!%p3282_p12)
}
  0x33   : > { %2829 = dma.hbm_to_vmem [thread:$0]  (!%p3611_p2), %s3896_s5, 2048, %s328_s12, [#allocation9], %s3470_s20, %s3470_s20, %s3471_s21  }
  0x34   : > { %s3472_s28 = smov [#allocation7]  }
  0x35   : > { %s311_s29 = sshll.u32 %s3472_s28, 4  ;;  %s312_s29 = int_to_ptr.vmem [resolvable:$true] %s311_s29 }
  0x36   : > { %s3297_s11 = scalar_lea.vmem %s312_s29, 2048  ;;  %p3305_p1 = scmp.lt.s32.totalorder %s312_s29, %s312_s29 }
  0x37   : > { %p3298_p8 = scmp.ne.s32.totalorder %s312_s29, %s3297_s11  ;;  %p3306_p6 = scmp.lt.s32.totalorder %s3297_s11, %s3297_s11 }
  0x39   : > { %p3300_p4 = pnand %p3298_p8, %p3236_p0  ;;  %p3307_p11 = por %p3306_p6, %p3305_p1 }
  0x3b   : > { %p3301_p10 = pneg %p3300_p4 }
  0x3d   : > { %p3308_p3 = pnand %p3307_p11, %p3301_p10 }
  0x3f   : > { %3311 = shalt.err (!%p3308_p3)
}
  0x40   : > { %s3473_s22 = smov 64   ;;  %s3474_s19 = smov 4  }
  0x41   : > { %s3917_s3 = sld [smem:[#allocation22_spill]]  ;;  %s3475_s21 = smov [#allocation10]  }
  0x42   : > { %s343_s18 = sshll.u32 %s3475_s21, 4  ;;  %s344_s18 = int_to_ptr.vmem [resolvable:$true] %s343_s18 }
  0x43   : > { %s3323_s28 = scalar_lea.vmem %s344_s18, 12288  ;;  %p3331_p8 = scmp.lt.s32.totalorder %s344_s18, %s344_s18 }
  0x44   : > { %p3324_p7 = scmp.ne.s32.totalorder %s344_s18, %s3323_s28  ;;  %p3332_p4 = scmp.lt.s32.totalorder %s3323_s28, %s3323_s28 }
  0x46   : > { %p3326_p9 = pnand %p3324_p7, %p3236_p0  ;;  %p3333_p10 = por %p3332_p4, %p3331_p8 }
  0x47   : > { %2826 = dma.hbm_to_vmem [thread:$0]  (!%p3611_p2), %s3917_s3, 2048, %s312_s29, [#allocation6], %s3473_s22, %s3473_s22, %s3474_s19  }
  0x48   : > { %p3327_p12 = pneg %p3326_p9 }
  0x4a   : > { %p3334_p1 = pnand %p3333_p10, %p3327_p12 }
  0x4c   : > { %3337 = shalt.err (!%p3334_p1)
}
  0x4d   : > { %s3476_s11 = smov 384   ;;  %s3477_s1 = smov 24  }
  0x4e   : > { %2832 = dma.hbm_to_vmem [thread:$0]  (!%p3611_p2), %s3898_s7, 12288, %s344_s18, [#allocation9], %s3476_s11, %s3476_s11, %s3477_s1  }
  0x4f   : > { %p2514_p6 = scmp.ge.s32.totalorder %s3466_s16, 3 }
  0x51   : > { %356 = sbr.rel (%p2514_p6) target bundleno = 120 (0x78), region = 48 }
  0x56   : > { %359 = sbr.rel (!%p3582_p5) target bundleno = 120 (0x78), region = 52  ;;  %s360_s22 = sand.u32 (%p3582_p5), 1, %s3462_s15  }
  0x57   : > { %s2515_s19 = sshll.u32 (%p3582_p5), %s3466_s16, 1  ;;  %s2797_s20 = smul.u32 (%p3582_p5), 96, %s360_s22 }
  0x58   : > { %s366_s21 = ssub.s32 (%p3582_p5), 5, %s2515_s19  ;;  %s3657_s12 = scalar_lea.sflag (%p3582_p5), [#allocation3], %s360_s22 }
  0x59   : > { %p367_p0 = scmp.lt.s32.totalorder (%p3582_p5), %s366_s21, 2  ;;  %s364_s1 = scalar_lea.vmem (%p3582_p5), [#allocation2], %s2797_s20 }
  0x5b   : > { %s3932_s21 = smov (!%p367_p0, %s366_s21), 2 }
  0x5c   : > { %s3654_s28 = smul.u32 768, %s3932_s21 }
  0x5e   : > { %s372_s30 = ssub.s32 1536, %s3654_s28 }
  0x5f   : > { %373 = vsyncadd %s3657_s12, %s372_s30  ;;  %p2518_p5 = scmp.ne.s32.totalorder %s3654_s28, 0  ;;  %s2798_s23 = smul.u32 1536, %s3466_s16 }
  0x60   : > { %s379_s18 = sshll.u32 %s364_s1, 4  ;;  %s3342_s30 = scalar_lea.hbm %s3891_s0, 3840  ;;  %s3667_s18 = int_to_ptr.vmem [resolvable:$true] %s379_s18 }
  0x61   : > { %s3665_s19 = scalar_lea.hbm %s3891_s0, %s2798_s23 }
  0x62   : > { %s3338_s22 = scalar_lea.hbm %s3665_s19, %s3654_s28  ;;  %p3343_p7 = scmp.lt.s32.totalorder %s3665_s19, %s3891_s0 }
  0x63   : > { %p3339_p2 = scmp.ne.s32.totalorder %s3665_s19, %s3338_s22  ;;  %p3344_p9 = scmp.lt.s32.totalorder %s3342_s30, %s3338_s22 }
  0x65   : > { %p3340_p11 = pnand %p3339_p2, %p2518_p5  ;;  %p3345_p12 = por %p3344_p9, %p3343_p7 }
  0x67   : > { %p3341_p3 = pneg %p3340_p11 }
  0x69   : > { %p3346_p8 = pnand %p3345_p12, %p3341_p3 }
  0x6b   : > { %3349 = shalt.err (!%p3346_p8)
}
  0x6c   : > { %s3350_s23 = scalar_lea.vmem %s3667_s18, %s3654_s28  ;;  %s3478_s11 = smov [#allocation2]  }
  0x6d   : > { %p3351_p4 = scmp.ne.s32.totalorder %s3667_s18, %s3350_s23  ;;  %s3354_s29 = sshll.u32 %s3478_s11, 4  ;;  %s3355_s29 = int_to_ptr.vmem [resolvable:$false] %s3354_s29 }
  0x6e   : > { %s3356_s20 = scalar_lea.vmem %s3355_s29, 3072  ;;  %p3357_p6 = scmp.lt.s32.totalorder %s3667_s18, %s3355_s29 }
  0x6f   : > { %p3352_p10 = pnand %p3351_p4, %p2518_p5  ;;  %p3358_p0 = scmp.lt.s32.totalorder %s3356_s20, %s3350_s23 }
  0x71   : > { %p3353_p1 = pneg %p3352_p10  ;;  %p3359_p2 = por %p3358_p0, %p3357_p6 }
  0x73   : > { %p3360_p11 = pnand %p3359_p2, %p3353_p1 }
  0x75   : > { %3363 = shalt.err (!%p3360_p11)
}
  0x76   : > { %s3479_s3 = smov 768   ;;  %s3480_s22 = smov 48  }
  0x77   : > { %385 = dma.hbm_to_vmem [thread:$0]  (%p2518_p5), %s3665_s19, %s3654_s28, %s3667_s18, %s3657_s12, %s3479_s3, %s3479_s3, %s3480_s22  }
  0x78 PF: > { %391 = sbr.rel (%p3603_p13) target bundleno = 1238 (0x4d6), region = 56  ;;  %s3696_s21 = sand.u32 (!%p3603_p13), 1, %s3458_s14  }
  0x79   : > { %s2799_s30 = smul.u32 (!%p3603_p13), 96, %s3696_s21  ;;  %s394_s1 = scalar_lea.sflag (!%p3603_p13), [#allocation3], %s3696_s21 }
  0x7a   : > { %p3918_p3 = scmp.ne.s32.totalorder (!%p3603_p13), %s3911_s24, 0 }
  0x7b   : > { %s3702_s23 = scalar_lea.vmem (!%p3603_p13), [#allocation2], %s2799_s30 }
  0x7d   : > { %3433 = dma.done.wait (%p3918_p3), %s394_s1, 1536  }
  0x7e   : > { %3435 = vsyncadd (%p3918_p3), %s394_s1, 4294965760  ;;  %p3919_p5 = scmp.eq.s32.totalorder %s3564_s17, 0 }
  0x80   : > { %3437 = dma.done.wait (%p3919_p5), [#allocation6], 14336   ;;  %p3920_p13 = pmov %p3919_p5 }
  0x81   : > { %p3921_p7 = pmov %p3919_p5 }
  0x82   : > { %3439 = vsyncadd (%p3920_p13), [#allocation6], 4294952960 }
  0x83   : > { %3441 = dma.done.wait (%p3921_p7), [#allocation9], 14336   ;;  %p3922_p9 = pmov %p3919_p5 }
  0x84   : > { %v2898_v0 = vld [vmem:[#allocation5 + $0x74] ss:$8 sps:$4 sm:$0xff]   ;;  %v2900_v1 = vld [vmem:[#allocation5 + $0x70] ss:$8 sps:$4 sm:$0xff]   ;;  %v2904_v4 = vld [vmem:[#allocation5 + $0x64] ss:$8 sps:$4 sm:$0xff]  }
  0x85   : > { %3443 = vsyncadd (%p3922_p9), [#allocation9], 4294952960  ;;  %1082 = vmatprep.subr.bf16.mxu0 %v2898_v0  ;;  %v2901_v2 = vld [vmem:[#allocation5 + $0x174] ss:$8 sps:$4 sm:$0xff]   ;;  %v2903_v3 = vld [vmem:[#allocation5 + $0x170] ss:$8 sps:$4 sm:$0xff]  }
  0x86   : > { %1083 = vmatpush1.bf16.msra.mxu0 %v2900_v1  ;;  %v2906_v5 = vld [vmem:[#allocation5 + $0x60] ss:$8 sps:$4 sm:$0xff]   ;;  %1125 = vmatprep.subr.bf16.mxu1 %v2901_v2  ;;  %v2907_v6 = vld [vmem:[#allocation5 + $0x164] ss:$8 sps:$4 sm:$0xff]   ;;  %v2910_v8 = vld [vmem:[#allocation5 + $0x54] ss:$8 sps:$4 sm:$0xff]  }
  0x87   : > { %1126 = vmatpush1.bf16.msra.mxu1 %v2903_v3  ;;  %1084 = vmatprep.subr.bf16.mxu0 %v2904_v4  ;;  %v2909_v7 = vld [vmem:[#allocation5 + $0x160] ss:$8 sps:$4 sm:$0xff]   ;;  %v2912_v9 = vld [vmem:[#allocation5 + $0x50] ss:$8 sps:$4 sm:$0xff]   ;;  %v2913_v10 = vld [vmem:[#allocation5 + $0x154] ss:$8 sps:$4 sm:$0xff]  }
  0x88   : > { %1127 = vmatprep.subr.bf16.mxu1 %v2907_v6  ;;  %v2916_v11 = vld [vmem:[#allocation5 + $0x44] ss:$8 sps:$4 sm:$0xff]   ;;  %v2915_v12 = vld [vmem:[#allocation5 + $0x150] ss:$8 sps:$4 sm:$0xff]   ;;  %v2918_v14 = vld [vmem:[#allocation5 + $0x40] ss:$8 sps:$4 sm:$0xff]  }
  0x89   : > { %v2919_v13 = vld [vmem:[#allocation5 + $0x144] ss:$8 sps:$4 sm:$0xff]   ;;  %v2922_v15 = vld [vmem:[#allocation5 + $0x34] ss:$8 sps:$4 sm:$0xff]   ;;  %v2921_v16 = vld [vmem:[#allocation5 + $0x140] ss:$8 sps:$4 sm:$0xff]  }
  0x8a   : > { %1085 = vmatpush1.bf16.msra.mxu0 %v2906_v5  ;;  %v2925_v17 = vld [vmem:[#allocation5 + $0x134] ss:$8 sps:$4 sm:$0xff]   ;;  %v2924_v18 = vld [vmem:[#allocation5 + $0x30] ss:$8 sps:$4 sm:$0xff]   ;;  %v2928_v19 = vld [vmem:[#allocation5 + $0x24] ss:$8 sps:$4 sm:$0xff]  }
  0x8b   : > { %1086 = vmatprep.subr.bf16.mxu0 %v2910_v8  ;;  %1128 = vmatpush1.bf16.msra.mxu1 %v2909_v7  ;;  %v2927_v20 = vld [vmem:[#allocation5 + $0x130] ss:$8 sps:$4 sm:$0xff]   ;;  %v2931_v21 = vld [vmem:[#allocation5 + $0x124] ss:$8 sps:$4 sm:$0xff]   ;;  %v2930_v22 = vld [vmem:[#allocation5 + $0x20] ss:$8 sps:$4 sm:$0xff]  }
  0x8c   : > { %1129 = vmatprep.subr.bf16.mxu1 %v2913_v10  ;;  %v2934_v23 = vld [vmem:[#allocation5 + $0x14] ss:$8 sps:$4 sm:$0xff]   ;;  %v2933_v24 = vld [vmem:[#allocation5 + $0x120] ss:$8 sps:$4 sm:$0xff]   ;;  %v2936_v26 = vld [vmem:[#allocation5 + $0x10] ss:$8 sps:$4 sm:$0xff]  }
  0x8d   : > { %v2937_v25 = vld [vmem:[#allocation5 + $0x114] ss:$8 sps:$4 sm:$0xff]   ;;  %v2940_v27 = vld [vmem:[#allocation5 + $0x4] ss:$8 sps:$4 sm:$0xff]   ;;  %v2939_v28 = vld [vmem:[#allocation5 + $0x110] ss:$8 sps:$4 sm:$0xff]  }
  0x8e   : > { %1087 = vmatpush1.bf16.msra.mxu0 %v2912_v9  ;;  %v2943_v29 = vld [vmem:[#allocation5 + $0x104] ss:$8 sps:$4 sm:$0xff]   ;;  %v2942_v30 = vld [vmem:[#allocation5] ss:$8 sps:$4 sm:$0xff]   ;;  %v2946_v31 = vld [vmem:[#allocation5 + $0xf4] ss:$8 sps:$4 sm:$0xff]  }
  0x8f   : > { %1088 = vmatprep.subr.bf16.mxu0 %v2916_v11  ;;  %1130 = vmatpush1.bf16.msra.mxu1 %v2915_v12  ;;  %v2945_v32 = vld [vmem:[#allocation5 + $0x100] ss:$8 sps:$4 sm:$0xff]   ;;  %v2949_v33 = vld [vmem:[#allocation5 + $0x1f4] ss:$8 sps:$4 sm:$0xff]   ;;  %v2948_v34 = vld [vmem:[#allocation5 + $0xf0] ss:$8 sps:$4 sm:$0xff]  }
  0x90   : > { %1131 = vmatprep.subr.bf16.mxu1 %v2919_v13  ;;  %v2952_v35 = vld [vmem:[#allocation5 + $0xe4] ss:$8 sps:$4 sm:$0xff]   ;;  %v2951_v36 = vld [vmem:[#allocation5 + $0x1f0] ss:$8 sps:$4 sm:$0xff]   ;;  %v2954_v38 = vld [vmem:[#allocation5 + $0xe0] ss:$8 sps:$4 sm:$0xff]  }
  0x91   : > { %v2955_v37 = vld [vmem:[#allocation5 + $0x1e4] ss:$8 sps:$4 sm:$0xff]   ;;  %v2958_v39 = vld [vmem:[#allocation5 + $0xd4] ss:$8 sps:$4 sm:$0xff]   ;;  %v2957_v40 = vld [vmem:[#allocation5 + $0x1e0] ss:$8 sps:$4 sm:$0xff]  }
  0x92   : > { %1089 = vmatpush1.bf16.msra.mxu0 %v2918_v14  ;;  %v2961_v41 = vld [vmem:[#allocation5 + $0x1d4] ss:$8 sps:$4 sm:$0xff]   ;;  %v2960_v42 = vld [vmem:[#allocation5 + $0xd0] ss:$8 sps:$4 sm:$0xff]   ;;  %v2964_v43 = vld [vmem:[#allocation5 + $0xc4] ss:$8 sps:$4 sm:$0xff]  }
  0x93   : > { %1090 = vmatprep.subr.bf16.mxu0 %v2922_v15  ;;  %1132 = vmatpush1.bf16.msra.mxu1 %v2921_v16  ;;  %v2963_v44 = vld [vmem:[#allocation5 + $0x1d0] ss:$8 sps:$4 sm:$0xff]   ;;  %v2967_v45 = vld [vmem:[#allocation5 + $0x1c4] ss:$8 sps:$4 sm:$0xff]   ;;  %v2966_v48 = vld [vmem:[#allocation5 + $0xc0] ss:$8 sps:$4 sm:$0xff]  }
  0x94   : > { %1133 = vmatprep.subr.bf16.mxu1 %v2925_v17  ;;  %v478_v46 = vld [vmem:[%s3702_s23 + $0x8] sm:$0xff]  ;;  %v484_v47 = vld [vmem:[%s3702_s23 + $0x38] sm:$0xff]  ;;  %v477_v5 = vld [vmem:[%s3702_s23] sm:$0xff]  ;;  %s2527_s18 = sshll.u32 %s3696_s21, 4  ;;  %s3770_s22 = scalar_lea.vmem [#allocation12], %s2799_s30 }
  0x95   : > { %v490_v49 = vpack.c.bf16 %v484_v47, %v478_v46  ;;  %v2970_v50 = vld [vmem:[#allocation5 + $0xb4] ss:$8 sps:$4 sm:$0xff]   ;;  %v2969_v51 = vld [vmem:[#allocation5 + $0x1c0] ss:$8 sps:$4 sm:$0xff]   ;;  %v2972_v56 = vld [vmem:[#allocation5 + $0xb0] ss:$8 sps:$4 sm:$0xff]  }
  0x96   : > { %1091 = vmatpush1.bf16.msra.mxu0 %v2924_v18  ;;  %v480_v52 = vld [vmem:[%s3702_s23 + $0x18] sm:$0xff]  ;;  %v486_v53 = vld [vmem:[%s3702_s23 + $0x48] sm:$0xff]  ;;  %v483_v7 = vld [vmem:[%s3702_s23 + $0x30] sm:$0xff]  ;;  %s3747_s19 = scalar_lea.vmem [#allocation11], %s2527_s18  ;;  %s2317_s30 = scalar_lea.sflag [#allocation4], %s3696_s21 }
  0x97   : > { %1092 = vmatprep.subr.bf16.mxu0 %v2928_v19  ;;  %1134 = vmatpush1.bf16.msra.mxu1 %v2927_v20  ;;  %v2973_v54 = vld [vmem:[#allocation5 + $0x1b4] ss:$8 sps:$4 sm:$0xff]   ;;  %v492_v55 = vpack.c.bf16 %v486_v53, %v480_v52  ;;  %v2976_v57 = vld [vmem:[#allocation5 + $0xa4] ss:$8 sps:$4 sm:$0xff]   ;;  %v2975_v58 = vld [vmem:[#allocation5 + $0x1b0] ss:$8 sps:$4 sm:$0xff]   ;;  %v489_v11 = vpack.c.bf16 %v483_v7, %v477_v5 }
  0x98   : > { %1135 = vmatprep.subr.bf16.mxu1 %v2931_v21  ;;  %1114 = vmatprep.mubr.bf16.mxu0 %v490_v49  ;;  %v2979_v59 = vld [vmem:[#allocation5 + $0x1a4] ss:$8 sps:$4 sm:$0xff]   ;;  %v2978_v60 = vld [vmem:[#allocation5 + $0xa0] ss:$8 sps:$4 sm:$0xff]   ;;  %v2982_v61 = vld [vmem:[#allocation5 + $0x94] ss:$8 sps:$4 sm:$0xff]  }
  0x99   : > { %1157 = vmatprep.mubr.bf16.mxu1 %v492_v55  ;;  %v2981_v62 = vld [vmem:[#allocation5 + $0x1a0] ss:$8 sps:$4 sm:$0xff]   ;;  %v2985_v63 = vld [vmem:[#allocation5 + $0x194] ss:$8 sps:$4 sm:$0xff]   ;;  %v2984_v0 = vld [vmem:[#allocation5 + $0x90] ss:$8 sps:$4 sm:$0xff]  }
  0x9a   : > { %1093 = vmatpush1.bf16.msra.mxu0 %v2930_v22  ;;  %v2987_v1 = vld [vmem:[#allocation5 + $0x190] ss:$8 sps:$4 sm:$0xff]   ;;  %v2988_v2 = vld [vmem:[#allocation5 + $0x84] ss:$8 sps:$4 sm:$0xff]   ;;  %v2990_v3 = vld [vmem:[#allocation5 + $0x80] ss:$8 sps:$4 sm:$0xff]  }
  0x9b   : > { %1094 = vmatprep.subr.bf16.mxu0 %v2934_v23  ;;  %1136 = vmatpush1.bf16.msra.mxu1 %v2933_v24  ;;  %v2991_v4 = vld [vmem:[#allocation5 + $0x184] ss:$8 sps:$4 sm:$0xff]   ;;  %v2993_v6 = vld [vmem:[#allocation5 + $0x180] ss:$8 sps:$4 sm:$0xff]   ;;  %v2996_v8 = vld [vmem:[#allocation5 + $0x274] ss:$8 sps:$4 sm:$0xff]  }
  0x9c   : > { %1137 = vmatprep.subr.bf16.mxu1 %v2937_v25  ;;  %v479_v9 = vld [vmem:[%s3702_s23 + $0x10] sm:$0xff]  ;;  %v485_v10 = vld [vmem:[%s3702_s23 + $0x40] sm:$0xff]  ;;  %v482_v15 = vld [vmem:[%s3702_s23 + $0x28] sm:$0xff]  ;;  %s2322_s1 = scalar_lea.sflag [#allocation13], %s3696_s21  ;;  %p3923_p12 = scmp.ne.s32.totalorder %s3912_s25, 0 }
  0x9d   : > { %v2994_v12 = vld [vmem:[#allocation5 + $0x270] ss:$8 sps:$4 sm:$0xff]   ;;  %v491_v13 = vpack.c.bf16 %v485_v10, %v479_v9  ;;  %v2999_v14 = vld [vmem:[#allocation5 + $0x264] ss:$8 sps:$4 sm:$0xff]   ;;  %v2997_v16 = vld [vmem:[#allocation5 + $0x260] ss:$8 sps:$4 sm:$0xff]  }
  0x9e   : > { %1095 = vmatpush1.bf16.msra.mxu0 %v2936_v26  ;;  %v488_v17 = vld [vmem:[%s3702_s23 + $0x58] sm:$0xff]  ;;  %v3005_v21 = vld [vmem:[#allocation5 + $0x244] ss:$8 sps:$4 sm:$0xff]   ;;  %v3003_v22 = vld [vmem:[#allocation5 + $0x240] ss:$8 sps:$4 sm:$0xff]  }
  0x9f   : > { %1096 = vmatprep.subr.bf16.mxu0 %v2940_v27  ;;  %1138 = vmatpush1.bf16.msra.mxu1 %v2939_v28  ;;  %v3002_v18 = vld [vmem:[#allocation5 + $0x254] ss:$8 sps:$4 sm:$0xff]   ;;  %v494_v19 = vpack.c.bf16 %v488_v17, %v482_v15  ;;  %v3000_v20 = vld [vmem:[#allocation5 + $0x250] ss:$8 sps:$4 sm:$0xff]   ;;  %v3011_v25 = vld [vmem:[#allocation5 + $0x224] ss:$8 sps:$4 sm:$0xff]  }
  0xa0   : > { %1139 = vmatprep.subr.bf16.mxu1 %v2943_v29  ;;  %v3008_v23 = vld [vmem:[#allocation5 + $0x234] ss:$8 sps:$4 sm:$0xff]   ;;  %v3006_v24 = vld [vmem:[#allocation5 + $0x230] ss:$8 sps:$4 sm:$0xff]   ;;  %v3009_v26 = vld [vmem:[#allocation5 + $0x220] ss:$8 sps:$4 sm:$0xff]  }
  0xa1   : > { %v3014_v27 = vld [vmem:[#allocation5 + $0x214] ss:$8 sps:$4 sm:$0xff]   ;;  %v3012_v28 = vld [vmem:[#allocation5 + $0x210] ss:$8 sps:$4 sm:$0xff]   ;;  %v3017_v29 = vld [vmem:[#allocation5 + $0x204] ss:$8 sps:$4 sm:$0xff]  }
  0xa2   : > { %1097 = vmatpush1.bf16.msra.mxu0 %v2942_v30  ;;  %v3015_v30 = vld [vmem:[#allocation5 + $0x200] ss:$8 sps:$4 sm:$0xff]   ;;  %v3044_v52 = vld [vmem:[#allocation7 + $0x70] sm:$0xff]  }
  0xa3   : > { %1098 = vmatprep.subr.bf16.mxu0 %v2946_v31  ;;  %1140 = vmatpush1.bf16.msra.mxu1 %v2945_v32  ;;  %v3020_v31 = vld [vmem:[#allocation5 + $0x2f4] ss:$8 sps:$4 sm:$0xff]   ;;  %v3018_v32 = vld [vmem:[#allocation5 + $0x2f0] ss:$8 sps:$4 sm:$0xff]   ;;  %v3039_v46 = vld [vmem:[#allocation5 + $0x280] ss:$8 sps:$4 sm:$0xff]  }
  0xa4   : > { %1141 = vmatprep.subr.bf16.mxu1 %v2949_v33  ;;  %v3023_v33 = vld [vmem:[#allocation5 + $0x2e4] ss:$8 sps:$4 sm:$0xff]   ;;  %v3045_v53 = vld [vmem:[#allocation7 + $0x30] sm:$0xff]  }
  0xa5   : > { %v481_v47 = vld [vmem:[%s3702_s23 + $0x20] sm:$0xff]  ;;  %v3047_v55 = vld [vmem:[#allocation7 + $0x28] sm:$0xff]  }
  0xa6   : > { %1099 = vmatpush2.bf16.msra.mxu0 %v2948_v34  ;;  %v3021_v34 = vld [vmem:[#allocation5 + $0x2e0] ss:$8 sps:$4 sm:$0xff]  }
  0xa7   : > { %1100 = vmatprep.subr.bf16.mxu0 %v2952_v35  ;;  %1142 = vmatpush2.bf16.msra.mxu1 %v2951_v36  ;;  %v3026_v35 = vld [vmem:[#allocation5 + $0x2d4] ss:$8 sps:$4 sm:$0xff]   ;;  %v3024_v36 = vld [vmem:[#allocation5 + $0x2d0] ss:$8 sps:$4 sm:$0xff]  }
  0xa8   : > { %1143 = vmatprep.subr.bf16.mxu1 %v2955_v37  ;;  %v3029_v37 = vld [vmem:[#allocation5 + $0x2c4] ss:$8 sps:$4 sm:$0xff]  }
  0xaa   : > { %1101 = vmatpush2.bf16.msra.mxu0 %v2954_v38  ;;  %v3027_v38 = vld [vmem:[#allocation5 + $0x2c0] ss:$8 sps:$4 sm:$0xff]  }
  0xab   : > { %1102 = vmatprep.subr.bf16.mxu0 %v2958_v39  ;;  %1144 = vmatpush2.bf16.msra.mxu1 %v2957_v40  ;;  %v3032_v39 = vld [vmem:[#allocation5 + $0x2b4] ss:$8 sps:$4 sm:$0xff]   ;;  %v3030_v40 = vld [vmem:[#allocation5 + $0x2b0] ss:$8 sps:$4 sm:$0xff]  }
  0xac   : > { %1145 = vmatprep.subr.bf16.mxu1 %v2961_v41  ;;  %v3035_v41 = vld [vmem:[#allocation5 + $0x2a4] ss:$8 sps:$4 sm:$0xff]  }
  0xae   : > { %1103 = vmatpush2.bf16.msra.mxu0 %v2960_v42  ;;  %v3033_v42 = vld [vmem:[#allocation5 + $0x2a0] ss:$8 sps:$4 sm:$0xff]  }
  0xaf   : > { %1104 = vmatprep.subr.bf16.mxu0 %v2964_v43  ;;  %1146 = vmatpush2.bf16.msra.mxu1 %v2963_v44  ;;  %v3038_v43 = vld [vmem:[#allocation5 + $0x294] ss:$8 sps:$4 sm:$0xff]   ;;  %v3036_v44 = vld [vmem:[#allocation5 + $0x290] ss:$8 sps:$4 sm:$0xff]  }
  0xb0   : > { %1147 = vmatprep.subr.bf16.mxu1 %v2967_v45  ;;  %v3041_v45 = vld [vmem:[#allocation5 + $0x284] ss:$8 sps:$4 sm:$0xff]  }
  0xb2   : > { %1105 = vmatpush2.bf16.msra.mxu0 %v2966_v48  ;;  %v487_v48 = vld [vmem:[%s3702_s23 + $0x50] sm:$0xff]  ;;  %s2759_s23 = sshll.u32 (%p3923_p12), %s3564_s17, 1 }
  0xb3   : > { %1106 = vmatprep.subr.bf16.mxu0 %v2970_v50  ;;  %1148 = vmatpush2.bf16.msra.mxu1 %v2969_v51  ;;  %v493_v49 = vpack.c.bf16 %v487_v48, %v481_v47  ;;  %v3042_v50 = vld [vmem:[#allocation7 + $0x78] sm:$0xff]   ;;  %s2330_s24 = ssub.s32 (%p3923_p12), 5, %s2759_s23 }
  0xb4   : > { %1149 = vmatprep.subr.bf16.mxu1 %v2973_v54  ;;  %v3043_v51 = vld [vmem:[#allocation7 + $0x38] sm:$0xff]   ;;  %v3046_v54 = vld [vmem:[#allocation7 + $0x68] sm:$0xff]   ;;  %p2331_p8 = scmp.lt.s32.totalorder (%p3923_p12), %s2330_s24, 2 }
  0xb5   : > { %v3072_v47 = vld [vmem:[#allocation8 + $0x34] ss:$8 sps:$4 sm:$0xff]   ;;  %v3070_v48 = vld [vmem:[#allocation8 + $0x30] ss:$8 sps:$4 sm:$0xff]  }
  0xb6   : > { %1107 = vmatpush2.bf16.msra.mxu0 %v2972_v56  ;;  %v3048_v56 = vld [vmem:[#allocation7 + $0x60] sm:$0xff]  }
  0xb7   : > { %1108 = vmatprep.subr.bf16.mxu0 %v2976_v57  ;;  %1150 = vmatpush2.bf16.msra.mxu1 %v2975_v58  ;;  %v3049_v57 = vld [vmem:[#allocation7 + $0x20] sm:$0xff]   ;;  %v3050_v58 = vld [vmem:[#allocation7 + $0x58] sm:$0xff]  }
  0xb8   : > { %1151 = vmatprep.subr.bf16.mxu1 %v2979_v59  ;;  %v3051_v59 = vld [vmem:[#allocation7 + $0x18] sm:$0xff]  }
  0xba   : > { %1109 = vmatpush2.bf16.msra.mxu0 %v2978_v60  ;;  %v3052_v60 = vld [vmem:[#allocation7 + $0x50] sm:$0xff]  }
  0xbb   : > { %1110 = vmatprep.subr.bf16.mxu0 %v2982_v61  ;;  %1152 = vmatpush2.bf16.msra.mxu1 %v2981_v62  ;;  %v3053_v61 = vld [vmem:[#allocation7 + $0x10] sm:$0xff]   ;;  %v3054_v62 = vld [vmem:[#allocation7 + $0x48] sm:$0xff]  }
  0xbc   : > { %1153 = vmatprep.subr.bf16.mxu1 %v2985_v63  ;;  %v3055_v63 = vld [vmem:[#allocation7 + $0x8] sm:$0xff]  }
  0xbe   : > { %1111 = vmatpush2.bf16.msra.mxu0 %v2984_v0  ;;  %v3056_v0 = vld [vmem:[#allocation7 + $0x40] sm:$0xff]  }
  0xbf   : > { %1112 = vmatprep.subr.bf16.mxu0 %v2988_v2  ;;  %1154 = vmatpush2.bf16.msra.mxu1 %v2987_v1  ;;  %v3057_v1 = vld [vmem:[#allocation7] sm:$0xff]   ;;  %v592_v2 = vlaneseq }
  0xc0   : > { %1155 = vmatprep.subr.bf16.mxu1 %v2991_v4 }
  0xc1   : > { %v3729_v4 = vshrl.u32 %v592_v2, 7 }
  0xc2   : > { %1113 = vmatpush2.bf16.msra.mxu0 %v2990_v3 }
  0xc3   : > { %1168 = vmatprep.subr.bf16.mxu0 %v2996_v8  ;;  %1156 = vmatpush2.bf16.msra.mxu1 %v2993_v6  ;;  %v3732_v7 = vsub.s32 1, %v3729_v4  ;;  %v473_v8 = vld [vmem:[%s3893_s2] sm:$0x3]  ;;  %v3738_v9 = vsub.s32 0, %v3729_v4 }
  0xc4   : > { %2775 = vmatprep.subr.bf16.mxu1 %v3042_v50  ;;  %v3073_v50 = vld [vmem:[#allocation8 + $0x20] ss:$8 sps:$4 sm:$0xff]  }
  0xc5   : > { %1115 = vmatmul.mubr.bf16.vlgmr.msra.gmra.mxu0 %v489_v11 }
  0xc6   : > { %1169 = vmatpush1.bf16.msra.mxu0 %v2994_v12  ;;  %1158 = vmatmul.mubr.bf16.vlgmr.msra.gmra.mxu1 %v491_v13  ;;  %v599_v12 = vrot.slane %v473_v8, %v3732_v7  ;;  %v595_v13 = vrot.slane %v473_v8, %v3738_v9  ;;  %v3120_v8 = vld [vmem:[#allocation10 + $0x34] ss:$24 sps:$4 sm:$0xff]  }
  0xc7   : > { %1170 = vmatprep.subr.bf16.mxu0 %v2999_v14  ;;  %1200 = vmatprep.mubr.bf16.mxu0 %v494_v19 }
  0xc8   : > { %2776 = vmatpush3.bf16.msra.mxu1 %v3043_v51  ;;  %v3078_v51 = vld [vmem:[#allocation8 + $0x14] ss:$8 sps:$4 sm:$0xff]  }
  0xc9   : > { %2777 = vmatprep.subr.bf16.mxu1 %v3044_v52  ;;  %v3481_v52 = vmov 0  }
  0xca   : > { %1171 = vmatpush1.bf16.msra.mxu0 %v2997_v16 }
  0xcb   : > { %1172 = vmatprep.subr.bf16.mxu0 %v3002_v18 }
  0xcc   : > { %2778 = vmatpush3.bf16.msra.mxu1 %v3045_v53  ;;  %v3076_v53 = vld [vmem:[#allocation8 + $0x10] ss:$8 sps:$4 sm:$0xff]  }
  0xcd   : > { %2779 = vmatprep.subr.bf16.mxu1 %v3046_v54  ;;  %v3081_v54 = vld [vmem:[#allocation8 + $0x4] ss:$8 sps:$4 sm:$0xff]  }
  0xce   : > { %1173 = vmatpush1.bf16.msra.mxu0 %v3000_v20 }
  0xcf   : > { %1174 = vmatprep.subr.bf16.mxu0 %v3005_v21 }
  0xd0   : > { %2780 = vmatpush3.bf16.msra.mxu1 %v3047_v55  ;;  %v3079_v55 = vld [vmem:[#allocation8] ss:$8 sps:$4 sm:$0xff]  }
  0xd1   : > { %2781 = vmatprep.subr.bf16.mxu1 %v3048_v56  ;;  %v3082_v56 = vld [vmem:[#allocation10 + $0x150] ss:$24 sps:$4 sm:$0xff]  }
  0xd2   : > { %1175 = vmatpush1.bf16.msra.mxu0 %v3003_v22 }
  0xd3   : > { %1176 = vmatprep.subr.bf16.mxu0 %v3008_v23 }
  0xd4   : > { %2782 = vmatpush3.bf16.msra.mxu1 %v3049_v57  ;;  %v3084_v57 = vld [vmem:[#allocation10 + $0x154] ss:$24 sps:$4 sm:$0xff]  }
  0xd5   : > { %2783 = vmatprep.subr.bf16.mxu1 %v3050_v58  ;;  %v3087_v58 = vld [vmem:[#allocation10 + $0x15c] ss:$24 sps:$4 sm:$0xff]  }
  0xd6   : > { %1177 = vmatpush1.bf16.msra.mxu0 %v3006_v24 }
  0xd7   : > { %1178 = vmatprep.subr.bf16.mxu0 %v3011_v25 }
  0xd8   : > { %2784 = vmatpush3.bf16.msra.mxu1 %v3051_v59  ;;  %v3090_v59 = vld [vmem:[#allocation10 + $0x124] ss:$24 sps:$4 sm:$0xff]  }
  0xd9   : > { %2785 = vmatprep.subr.bf16.mxu1 %v3052_v60  ;;  %v3088_v60 = vld [vmem:[#allocation10 + $0x120] ss:$24 sps:$4 sm:$0xff]  }
  0xda   : > { %1179 = vmatpush1.bf16.msra.mxu0 %v3009_v26 }
  0xdb   : > { %1180 = vmatprep.subr.bf16.mxu0 %v3014_v27 }
  0xdc   : > { %2786 = vmatpush3.bf16.msra.mxu1 %v3053_v61  ;;  %v3096_v61 = vld [vmem:[#allocation10 + $0xf4] ss:$24 sps:$4 sm:$0xff]  }
  0xdd   : > { %2787 = vmatprep.subr.bf16.mxu1 %v3054_v62  ;;  %v3094_v62 = vld [vmem:[#allocation10 + $0xf0] ss:$24 sps:$4 sm:$0xff]  }
  0xde   : > { %1181 = vmatpush1.bf16.msra.mxu0 %v3012_v28 }
  0xdf   : > { %1182 = vmatprep.subr.bf16.mxu0 %v3017_v29 }
  0xe0   : > { %2788 = vmatpush3.bf16.msra.mxu1 %v3055_v63  ;;  %v3102_v63 = vld [vmem:[#allocation10 + $0xc4] ss:$24 sps:$4 sm:$0xff]  }
  0xe1   : > { %2789 = vmatprep.subr.bf16.mxu1 %v3056_v0  ;;  %v3100_v0 = vld [vmem:[#allocation10 + $0xc0] ss:$24 sps:$4 sm:$0xff]  }
  0xe2   : > { %1183 = vmatpush1.bf16.msra.mxu0 %v3015_v30 }
  0xe3   : > { %1184 = vmatprep.subr.bf16.mxu0 %v3020_v31 }
  0xe4   : > { %2790 = vmatpush3.bf16.msra.mxu1 %v3057_v1  ;;  %v3108_v1 = vld [vmem:[#allocation10 + $0x94] ss:$24 sps:$4 sm:$0xff]  }
  0xe6   : > { %1185 = vmatpush2.bf16.msra.mxu0 %v3018_v32 }
  0xe7   : > { %1186 = vmatprep.subr.bf16.mxu0 %v3023_v33 }
  0xea   : > { %1187 = vmatpush2.bf16.msra.mxu0 %v3021_v34 }
  0xeb   : > { %1188 = vmatprep.subr.bf16.mxu0 %v3026_v35 }
  0xee   : > { %1189 = vmatpush2.bf16.msra.mxu0 %v3024_v36 }
  0xef   : > { %1190 = vmatprep.subr.bf16.mxu0 %v3029_v37 }
  0xf2   : > { %1191 = vmatpush2.bf16.msra.mxu0 %v3027_v38 }
  0xf3   : > { %1192 = vmatprep.subr.bf16.mxu0 %v3032_v39  ;;  %v3060_v39 = vld [vmem:[#allocation8 + $0x74] ss:$8 sps:$4 sm:$0xff]  }
  0xf4   : > { %1517 = vmatprep.subr.bf16.mxu1 %v3060_v39 }
  0xf6   : > { %1193 = vmatpush2.bf16.msra.mxu0 %v3030_v40  ;;  %v3058_v40 = vld [vmem:[#allocation8 + $0x70] ss:$8 sps:$4 sm:$0xff]  }
  0xf7   : > { %1194 = vmatprep.subr.bf16.mxu0 %v3035_v41  ;;  %v3063_v41 = vld [vmem:[#allocation8 + $0x64] ss:$8 sps:$4 sm:$0xff]  }
  0xfa   : > { %1195 = vmatpush2.bf16.msra.mxu0 %v3033_v42  ;;  %v3061_v42 = vld [vmem:[#allocation8 + $0x60] ss:$8 sps:$4 sm:$0xff]  }
  0xfb   : > { %1196 = vmatprep.subr.bf16.mxu0 %v3038_v43  ;;  %v3066_v43 = vld [vmem:[#allocation8 + $0x54] ss:$8 sps:$4 sm:$0xff]  }
  0xfe   : > { %1197 = vmatpush2.bf16.msra.mxu0 %v3036_v44  ;;  %v3064_v44 = vld [vmem:[#allocation8 + $0x50] ss:$8 sps:$4 sm:$0xff]  }
  0xff   : > { %1198 = vmatprep.subr.bf16.mxu0 %v3041_v45  ;;  %v3069_v45 = vld [vmem:[#allocation8 + $0x44] ss:$8 sps:$4 sm:$0xff]  }
 0x102   : > { %1199 = vmatpush2.bf16.msra.mxu0 %v3039_v46  ;;  %v3067_v46 = vld [vmem:[#allocation8 + $0x40] ss:$8 sps:$4 sm:$0xff]  }
 0x103   : > { %2173 = vmatprep.subr.bf16.mxu0 %v3084_v57  ;;  %v3127_v57 = vld [vmem:[#allocation10 + $0x8] ss:$24 sps:$4 sm:$0xff]  }
 0x105   : > { %1201 = vmatmul.mubr.bf16.vlgmr.msra.gmra.mxu0 %v493_v49  ;;  %v3075_v49 = vld [vmem:[#allocation8 + $0x24] ss:$8 sps:$4 sm:$0xff]  }
 0x106   : > { %2174 = vmatpush1.bf16.msra.mxu0 %v3082_v56  ;;  %v3129_v56 = vld [vmem:[#allocation10 + $0xc] ss:$24 sps:$4 sm:$0xff]  }
 0x107   : > { %2175 = vmatprep.subr.bf16.mxu0 %v3090_v59  ;;  %v3133_v59 = vld [vmem:[#allocation10 + $0x2d8] ss:$24 sps:$4 sm:$0xff]  }
 0x10a   : > { %2176 = vmatpush1.bf16.msra.mxu0 %v3088_v60  ;;  %v3141_v60 = vld [vmem:[#allocation10 + $0x2ac] ss:$24 sps:$4 sm:$0xff]  }
 0x10b   : > { %2177 = vmatprep.subr.bf16.mxu0 %v3096_v61  ;;  %v3139_v61 = vld [vmem:[#allocation10 + $0x2a8] ss:$24 sps:$4 sm:$0xff]  }
 0x10e   : > { %2178 = vmatpush1.bf16.msra.mxu0 %v3094_v62  ;;  %v3147_v62 = vld [vmem:[#allocation10 + $0x27c] ss:$24 sps:$4 sm:$0xff]  }
 0x10f   : > { %2179 = vmatprep.subr.bf16.mxu0 %v3102_v63  ;;  %v3145_v63 = vld [vmem:[#allocation10 + $0x278] ss:$24 sps:$4 sm:$0xff]  }
 0x112   : > { %2180 = vmatpush1.bf16.msra.mxu0 %v3100_v0  ;;  %v3153_v0 = vld [vmem:[#allocation10 + $0x24c] ss:$24 sps:$4 sm:$0xff]  }
 0x113   : > { %2181 = vmatprep.subr.bf16.mxu0 %v3108_v1  ;;  %v3151_v1 = vld [vmem:[#allocation10 + $0x248] ss:$24 sps:$4 sm:$0xff]  }
 0x185   : > { %v1116_v3 = vpop.f32.mrf.mxu0 }
 0x186   : > { %v1159_v6 = vpop.f32.mrf.mxu1  ;;  %v1117_v18 = vadd.f32 %v1116_v3, %v595_v13  ;;  %v3106_v3 = vld [vmem:[#allocation10 + $0x90] ss:$24 sps:$4 sm:$0xff]  }
 0x187   : > { %v1118_v5 = vpop.f32.mrf.mxu0  ;;  %2182 = vmatpush1.bf16.msra.mxu0 %v3106_v3  ;;  %v3159_v3 = vld [vmem:[#allocation10 + $0x21c] ss:$24 sps:$4 sm:$0xff]  }
 0x188   : > { %v1161_v11 = vpop.f32.mrf.mxu1  ;;  %v1119_v16 = vadd.f32 %v1118_v5, %v599_v12  ;;  %v1160_v25 = vadd.f32 %v1159_v6, %v1117_v18  ;;  %v3114_v5 = vld [vmem:[#allocation10 + $0x64] ss:$24 sps:$4 sm:$0xff]   ;;  %v3112_v6 = vld [vmem:[#allocation10 + $0x60] ss:$24 sps:$4 sm:$0xff]   ;;  %v3142_v18 = vld [vmem:[#allocation10 + $0x270] ss:$24 sps:$4 sm:$0xff]  }
 0x189   : > { %v1120_v10 = vpop.f32.mrf.mxu0  ;;  %2183 = vmatprep.subr.bf16.mxu0 %v3114_v5  ;;  %v3157_v5 = vld [vmem:[#allocation10 + $0x218] ss:$24 sps:$4 sm:$0xff]  }
 0x18a   : > { %v1163_v15 = vpop.f32.mrf.mxu1  ;;  %v1121_v17 = vadd.f32 %v1120_v10, %v595_v13  ;;  %v1162_v23 = vadd.f32 %v1161_v11, %v1119_v16  ;;  %v3118_v10 = vld [vmem:[#allocation10 + $0x30] ss:$24 sps:$4 sm:$0xff]   ;;  %v3126_v11 = vld [vmem:[#allocation10 + $0x4] ss:$24 sps:$4 sm:$0xff]   ;;  %v3132_v13 = vld [vmem:[#allocation10 + $0x2d4] ss:$24 sps:$4 sm:$0xff]  }
 0x18b   : > { %v1122_v14 = vpop.f32.mrf.mxu0  ;;  %2184 = vmatpush1.bf16.msra.mxu0 %v3112_v6  ;;  %v3136_v16 = vld [vmem:[#allocation10 + $0x2a0] ss:$24 sps:$4 sm:$0xff]   ;;  %v3162_v6 = vld [vmem:[#allocation10 + $0x1e4] ss:$24 sps:$4 sm:$0xff]  }
 0x18c   : > { %v1123_v20 = vadd.f32 %v1122_v14, %v599_v12  ;;  %v1165_v21 = vpop.f32.mrf.mxu1  ;;  %v1164_v24 = vadd.f32 %v1163_v15, %v1121_v17  ;;  %2185 = vmatprep.subr.bf16.mxu0 %v3120_v8  ;;  %v3124_v12 = vld [vmem:[#allocation10] ss:$24 sps:$4 sm:$0xff]   ;;  %v3130_v14 = vld [vmem:[#allocation10 + $0x2d0] ss:$24 sps:$4 sm:$0xff]   ;;  %v3138_v15 = vld [vmem:[#allocation10 + $0x2a4] ss:$24 sps:$4 sm:$0xff]  }
 0x18d   : > { %v3144_v17 = vld [vmem:[#allocation10 + $0x274] ss:$24 sps:$4 sm:$0xff]   ;;  %v3160_v8 = vld [vmem:[#allocation10 + $0x1e0] ss:$24 sps:$4 sm:$0xff]  }
 0x18e   : > { %v1166_v27 = vadd.f32 %v1165_v21, %v1123_v20  ;;  %v3148_v20 = vld [vmem:[#allocation10 + $0x240] ss:$24 sps:$4 sm:$0xff]   ;;  %v3156_v21 = vld [vmem:[#allocation10 + $0x214] ss:$24 sps:$4 sm:$0xff]  }
 0x18f   : > { %2186 = vmatpush1.bf16.msra.mxu0 %v3118_v10  ;;  %v3165_v10 = vld [vmem:[#allocation10 + $0x1ec] ss:$24 sps:$4 sm:$0xff]  }
 0x190   : > { %2187 = vmatprep.subr.bf16.mxu0 %v3126_v11  ;;  %v3163_v11 = vld [vmem:[#allocation10 + $0x1e8] ss:$24 sps:$4 sm:$0xff]  }
 0x193   : > { %2188 = vmatpush1.bf16.msra.mxu0 %v3124_v12  ;;  %v3168_v12 = vld [vmem:[#allocation10 + $0x1b4] ss:$24 sps:$4 sm:$0xff]  }
 0x194   : > { %2189 = vmatprep.subr.bf16.mxu0 %v3132_v13  ;;  %v3166_v13 = vld [vmem:[#allocation10 + $0x1b0] ss:$24 sps:$4 sm:$0xff]  }
 0x197   : > { %2190 = vmatpush2.bf16.msra.mxu0 %v3130_v14  ;;  %v3171_v14 = vld [vmem:[#allocation10 + $0x1bc] ss:$24 sps:$4 sm:$0xff]  }
 0x198   : > { %2191 = vmatprep.subr.bf16.mxu0 %v3138_v15  ;;  %v3169_v15 = vld [vmem:[#allocation10 + $0x1b8] ss:$24 sps:$4 sm:$0xff]  }
 0x19b   : > { %2192 = vmatpush2.bf16.msra.mxu0 %v3136_v16  ;;  %v3174_v16 = vld [vmem:[#allocation10 + $0x184] ss:$24 sps:$4 sm:$0xff]  }
 0x19c   : > { %2193 = vmatprep.subr.bf16.mxu0 %v3144_v17  ;;  %v3172_v17 = vld [vmem:[#allocation10 + $0x180] ss:$24 sps:$4 sm:$0xff]  }
 0x19f   : > { %2194 = vmatpush2.bf16.msra.mxu0 %v3142_v18  ;;  %v3177_v18 = vld [vmem:[#allocation10 + $0x18c] ss:$24 sps:$4 sm:$0xff]  }
 0x1c5   : > { %v1202_v19 = vpop.f32.mrf.mxu0 }
 0x1c6   : > { %v1203_v30 = vadd.f32 %v1202_v19, %v1160_v25  ;;  %v3150_v19 = vld [vmem:[#allocation10 + $0x244] ss:$24 sps:$4 sm:$0xff]  }
 0x1c7   : > { %v1204_v22 = vpop.f32.mrf.mxu0  ;;  %2195 = vmatprep.subr.bf16.mxu0 %v3150_v19  ;;  %v3175_v19 = vld [vmem:[#allocation10 + $0x188] ss:$24 sps:$4 sm:$0xff]  }
 0x1c8   : > { %v1205_v28 = vadd.f32 %v1204_v22, %v1162_v23  ;;  %v1211_v36 = vmax.f32 %v1203_v30, 0.0  ;;  %2196 = vmatpush2.bf16.msra.mxu0 %v3148_v20  ;;  %v3154_v22 = vld [vmem:[#allocation10 + $0x210] ss:$24 sps:$4 sm:$0xff]   ;;  %v3180_v20 = vld [vmem:[#allocation10 + $0x164] ss:$24 sps:$4 sm:$0xff]  }
 0x1c9   : > { %v1206_v26 = vpop.f32.mrf.mxu0  ;;  %2197 = vmatprep.subr.bf16.mxu0 %v3156_v21  ;;  %v475_v21 = vld [vmem:[%s3897_s6] sm:$0x3] }
 0x1ca   : > { %v1207_v29 = vadd.f32 %v1206_v26, %v1164_v24  ;;  %v1212_v34 = vmax.f32 %v1205_v28, 0.0  ;;  %v2624_v24 = vld [vmem:[%s3895_s4] ss:$0 sm:$0xff] }
 0x1cb   : > { %v1208_v31 = vpop.f32.mrf.mxu0 }
 0x1cc   : > { %v1209_v32 = vadd.f32 %v1208_v31, %v1166_v27  ;;  %v1213_v33 = vmax.f32 %v1207_v29, 0.0  ;;  %2198 = vmatpush2.bf16.msra.mxu0 %v3154_v22 }
 0x1cd   : > { %2199 = vmatprep.subr.bf16.mxu0 %v3162_v6  ;;  %v1673_v6 = vsub.s32 2, %v3729_v4 }
 0x1ce   : > { %v1214_v35 = vmax.f32 %v1209_v32, 0.0  ;;  %v1215_v38 = vpack.c.bf16 %v1213_v33, %v1211_v36 }
 0x1d0   : > { %v1216_v37 = vpack.c.bf16 %v1214_v35, %v1212_v34  ;;  %2200 = vmatpush2.bf16.msra.mxu0 %v3160_v8  ;;  %v476_v8 = vld [vmem:[%s3899_s8] sm:$0x3f] }
 0x1d1   : > { %2201 = vmatprep.subr.bf16.mxu0 %v3168_v12  ;;  %v1674_v12 = vrot.slane %v476_v8, %v1673_v6 }
 0x1d2   : > { %1383 = vmatprep.mubr.bf16.mxu1 %v1216_v37 }
 0x1d3   : > { %1384 = vmatmul.mubr.bf16.vlgmr.msra.gmra.mxu1 %v1215_v38  ;;  %v1405_v38 = vand.u32 127, %v592_v2  ;;  %v3099_v2 = vld [vmem:[#allocation10 + $0xfc] ss:$24 sps:$4 sm:$0xff]  }
 0x1d4   : > { %1518 = vmatpush1.bf16.msra.mxu1 %v3058_v40  ;;  %1549 = vmatprep.mubr.bf16.mxu1 %v3481_v52  ;;  %v3117_v52 = vld [vmem:[#allocation10 + $0x6c] ss:$24 sps:$4 sm:$0xff]  }
 0x1d5   : > { %1519 = vmatprep.subr.bf16.mxu1 %v3063_v41  ;;  %vm1406_vm0 = vcmp.lt.s32.totalorder %v1405_v38, 32  ;;  %2202 = vmatpush2.bf16.msra.mxu0 %v3166_v13  ;;  %v1670_v13 = vrot.slane %v476_v8, %v3732_v7 }
 0x1d6   : > { %vm2659_vm1 = vmpackc.low %vm1406_vm0, %vm1406_vm0  ;;  %2203 = vmatprep.subr.bf16.mxu0 %v3174_v16 }
 0x1d8   : > { %1520 = vmatpush1.bf16.msra.mxu1 %v3061_v42  ;;  %v3085_v42 = vld [vmem:[#allocation10 + $0x158] ss:$24 sps:$4 sm:$0xff]  }
 0x1d9   : > { %1521 = vmatprep.subr.bf16.mxu1 %v3066_v43  ;;  %2204 = vmatpush2.bf16.msra.mxu0 %v3172_v17 }
 0x1da   : > { %2259 = vmatprep.subr.bf16.mxu0 %v3180_v20 }
 0x1dc   : > { %1522 = vmatpush1.bf16.msra.mxu1 %v3064_v44 }
 0x1dd   : > { %1523 = vmatprep.subr.bf16.mxu1 %v3069_v45  ;;  %v3093_v45 = vld [vmem:[#allocation10 + $0x12c] ss:$24 sps:$4 sm:$0xff]  }
 0x1e0   : > { %1524 = vmatpush1.bf16.msra.mxu1 %v3067_v46  ;;  %v3091_v46 = vld [vmem:[#allocation10 + $0x128] ss:$24 sps:$4 sm:$0xff]  }
 0x1e1   : > { %1525 = vmatprep.subr.bf16.mxu1 %v3072_v47  ;;  %v3097_v47 = vld [vmem:[#allocation10 + $0xf8] ss:$24 sps:$4 sm:$0xff]  }
 0x1e4   : > { %1526 = vmatpush1.bf16.msra.mxu1 %v3070_v48  ;;  %v3105_v48 = vld [vmem:[#allocation10 + $0xcc] ss:$24 sps:$4 sm:$0xff]  }
 0x1e5   : > { %1527 = vmatprep.subr.bf16.mxu1 %v3075_v49  ;;  %v3103_v49 = vld [vmem:[#allocation10 + $0xc8] ss:$24 sps:$4 sm:$0xff]  }
 0x1e8   : > { %1528 = vmatpush1.bf16.msra.mxu1 %v3073_v50  ;;  %v3111_v50 = vld [vmem:[#allocation10 + $0x9c] ss:$24 sps:$4 sm:$0xff]  }
 0x1e9   : > { %1529 = vmatprep.subr.bf16.mxu1 %v3078_v51  ;;  %v3109_v51 = vld [vmem:[#allocation10 + $0x98] ss:$24 sps:$4 sm:$0xff]  }
 0x1ec   : > { %1530 = vmatpush1.bf16.msra.mxu1 %v3076_v53  ;;  %v3115_v53 = vld [vmem:[#allocation10 + $0x68] ss:$24 sps:$4 sm:$0xff]  }
 0x1ed   : > { %1531 = vmatprep.subr.bf16.mxu1 %v3081_v54  ;;  %v3123_v54 = vld [vmem:[#allocation10 + $0x3c] ss:$24 sps:$4 sm:$0xff]  }
 0x1f0   : > { %1532 = vmatpush1.bf16.msra.mxu1 %v3079_v55  ;;  %v3121_v55 = vld [vmem:[#allocation10 + $0x38] ss:$24 sps:$4 sm:$0xff]  }
 0x1f1   : > { %2216 = vmatprep.subr.bf16.mxu1 %v3087_v58  ;;  %v3135_v58 = vld [vmem:[#allocation10 + $0x2dc] ss:$24 sps:$4 sm:$0xff]  }
 0x293   : > { %v2791_v23 = vpop.f32.mrf.mxu1 }
 0x295   : > { %v2792_v25 = vpop.f32.mrf.mxu1 }
 0x296   : > { %v2793_v26 = vadd.f32 %v2792_v25, %v2791_v23  ;;  %v1434_v23 = vrot.slane %v475_v21, %v3732_v7 }
 0x297   : > { %v2794_v27 = vpop.f32.mrf.mxu1 }
 0x298   : > { %v1386_v28 = vadd.f32 %v2793_v26, %v2624_v24 }
 0x299   : > { %v2795_v29 = vpop.f32.mrf.mxu1 }
 0x29a   : > { %v2641_v30 = vmul.f32 -1.442695, %v1386_v28  ;;  %v2796_v31 = vadd.f32 %v2795_v29, %v2794_v27 }
 0x29c   : > { %3226 = vpow2.f32 %v2641_v30  ;;  %v1389_v32 = vadd.f32 %v2796_v31, %v2624_v24  ;;  %v1430_v24 = vrot.slane %v475_v21, %v3738_v9 }
 0x29e   : > { %v2642_v33 = vmul.f32 -1.442695, %v1389_v32 }
 0x2a0   : > { %3228 = vpow2.f32 %v2642_v33 }
 0x2a9   : > { %v3227_v34 = vpop.eup %3226 }
 0x2aa   : > { %v1398_v35 = vadd.f32 1.0, %v3227_v34 }
 0x2ac   : > { %3230 = vrcp.f32 %v1398_v35 }
 0x2ad   : > { %v3229_v36 = vpop.eup %3228 }
 0x2ae   : > { %v1399_v37 = vadd.f32 1.0, %v3229_v36 }
 0x2b0   : > { %3232 = vrcp.f32 %v1399_v37  ;;  %v3178_v37 = vld [vmem:[#allocation10 + $0x160] ss:$24 sps:$4 sm:$0xff]  }
 0x2b9   : > { %v3231_v39 = vpop.eup %3230 }
 0x2ba   : > { %v1407_v40 = vsel %vm1406_vm0, %v3231_v39, 0.0 }
 0x2bb   : > { %2302 = vst [vmem:[%s3747_s19] sm:$0xff] %v1407_v40  ;;  %v3181_v40 = vld [vmem:[#allocation10 + $0x130] ss:$24 sps:$4 sm:$0xff]  }
 0x2bd   : > { %v3233_v41 = vpop.eup %3232 }
 0x2be   : > { %v1408_v43 = vsel %vm1406_vm0, %v3233_v41, 0.0  ;;  %v2660_v44 = vpack.c.bf16 %v3233_v41, %v3231_v39  ;;  %v3183_v39 = vld [vmem:[#allocation10 + $0x134] ss:$24 sps:$4 sm:$0xff]   ;;  %v3186_v41 = vld [vmem:[#allocation10 + $0x104] ss:$24 sps:$4 sm:$0xff]  }
 0x2bf   : > { %2303 = vst [vmem:[%s3747_s19 + $0x8] sm:$0xff] %v1408_v43  ;;  %v3189_v43 = vld [vmem:[#allocation10 + $0xd4] ss:$24 sps:$4 sm:$0xff]  }
 0x2c0   : > { %2661 = vmatmul.mubr.msk.bf16.vlgmr.msra.gmra.mxu1 %vm2659_vm1, %v2660_v44  ;;  %v3187_v44 = vld [vmem:[#allocation10 + $0xd0] ss:$24 sps:$4 sm:$0xff]  }
 0x2c1   : > { %2217 = vmatpush1.bf16.msra.mxu1 %v3085_v42  ;;  %v3184_v42 = vld [vmem:[#allocation10 + $0x100] ss:$24 sps:$4 sm:$0xff]  }
 0x2c2   : > { %2218 = vmatprep.subr.bf16.mxu1 %v3093_v45  ;;  %v3192_v45 = vld [vmem:[#allocation10 + $0xa4] ss:$24 sps:$4 sm:$0xff]  }
 0x2c5   : > { %2219 = vmatpush1.bf16.msra.mxu1 %v3091_v46  ;;  %v3190_v46 = vld [vmem:[#allocation10 + $0xa0] ss:$24 sps:$4 sm:$0xff]  }
 0x2c6   : > { %2220 = vmatprep.subr.bf16.mxu1 %v3099_v2  ;;  %v3195_v2 = vld [vmem:[#allocation10 + $0x74] ss:$24 sps:$4 sm:$0xff]  }
 0x2c9   : > { %2221 = vmatpush1.bf16.msra.mxu1 %v3097_v47  ;;  %v3193_v47 = vld [vmem:[#allocation10 + $0x70] ss:$24 sps:$4 sm:$0xff]  }
 0x2ca   : > { %2222 = vmatprep.subr.bf16.mxu1 %v3105_v48  ;;  %v3198_v48 = vld [vmem:[#allocation10 + $0x44] ss:$24 sps:$4 sm:$0xff]  }
 0x2cd   : > { %2223 = vmatpush1.bf16.msra.mxu1 %v3103_v49  ;;  %v3196_v49 = vld [vmem:[#allocation10 + $0x40] ss:$24 sps:$4 sm:$0xff]  }
 0x2ce   : > { %2224 = vmatprep.subr.bf16.mxu1 %v3111_v50  ;;  %v3201_v50 = vld [vmem:[#allocation10 + $0x14] ss:$24 sps:$4 sm:$0xff]  }
 0x2d1   : > { %2225 = vmatpush1.bf16.msra.mxu1 %v3109_v51  ;;  %v3199_v51 = vld [vmem:[#allocation10 + $0x10] ss:$24 sps:$4 sm:$0xff]  }
 0x2d2   : > { %2226 = vmatprep.subr.bf16.mxu1 %v3117_v52  ;;  %v3204_v52 = vld [vmem:[#allocation10 + $0x2e4] ss:$24 sps:$4 sm:$0xff]  }
 0x2d5   : > { %2227 = vmatpush1.bf16.msra.mxu1 %v3115_v53  ;;  %v3202_v53 = vld [vmem:[#allocation10 + $0x2e0] ss:$24 sps:$4 sm:$0xff]  }
 0x2d6   : > { %2228 = vmatprep.subr.bf16.mxu1 %v3123_v54  ;;  %v3207_v54 = vld [vmem:[#allocation10 + $0x2b4] ss:$24 sps:$4 sm:$0xff]  }
 0x2d9   : > { %2229 = vmatpush1.bf16.msra.mxu1 %v3121_v55  ;;  %v3205_v55 = vld [vmem:[#allocation10 + $0x2b0] ss:$24 sps:$4 sm:$0xff]  }
 0x2da   : > { %2230 = vmatprep.subr.bf16.mxu1 %v3129_v56  ;;  %v3210_v56 = vld [vmem:[#allocation10 + $0x284] ss:$24 sps:$4 sm:$0xff]  }
 0x2dd   : > { %2231 = vmatpush1.bf16.msra.mxu1 %v3127_v57  ;;  %v3208_v57 = vld [vmem:[#allocation10 + $0x280] ss:$24 sps:$4 sm:$0xff]  }
 0x2de   : > { %2232 = vmatprep.subr.bf16.mxu1 %v3135_v58  ;;  %v3213_v58 = vld [vmem:[#allocation10 + $0x254] ss:$24 sps:$4 sm:$0xff]  }
 0x2e1   : > { %2233 = vmatpush2.bf16.msra.mxu1 %v3133_v59  ;;  %v3211_v59 = vld [vmem:[#allocation10 + $0x250] ss:$24 sps:$4 sm:$0xff]  }
 0x2e2   : > { %2234 = vmatprep.subr.bf16.mxu1 %v3141_v60  ;;  %v3216_v60 = vld [vmem:[#allocation10 + $0x224] ss:$24 sps:$4 sm:$0xff]  }
 0x2e5   : > { %2235 = vmatpush2.bf16.msra.mxu1 %v3139_v61  ;;  %v3214_v61 = vld [vmem:[#allocation10 + $0x220] ss:$24 sps:$4 sm:$0xff]  }
 0x2e6   : > { %2236 = vmatprep.subr.bf16.mxu1 %v3147_v62  ;;  %v3219_v62 = vld [vmem:[#allocation10 + $0x1f4] ss:$24 sps:$4 sm:$0xff]  }
 0x2e9   : > { %2237 = vmatpush2.bf16.msra.mxu1 %v3145_v63  ;;  %v3217_v63 = vld [vmem:[#allocation10 + $0x1f0] ss:$24 sps:$4 sm:$0xff]  }
 0x2ea   : > { %2238 = vmatprep.subr.bf16.mxu1 %v3153_v0  ;;  %v3222_v0 = vld [vmem:[#allocation10 + $0x1c4] ss:$24 sps:$4 sm:$0xff]  }
 0x2ed   : > { %2239 = vmatpush2.bf16.msra.mxu1 %v3151_v1  ;;  %v3220_v1 = vld [vmem:[#allocation10 + $0x1c0] ss:$24 sps:$4 sm:$0xff]  }
 0x2ee   : > { %2240 = vmatprep.subr.bf16.mxu1 %v3159_v3  ;;  %v3225_v3 = vld [vmem:[#allocation10 + $0x194] ss:$24 sps:$4 sm:$0xff]  }
 0x2f1   : > { %2241 = vmatpush2.bf16.msra.mxu1 %v3157_v5  ;;  %v3223_v5 = vld [vmem:[#allocation10 + $0x190] ss:$24 sps:$4 sm:$0xff]  }
 0x2f2   : > { %2242 = vmatprep.subr.bf16.mxu1 %v3165_v10  ;;  %v1677_v10 = vsub.s32 3, %v3729_v4 }
 0x2f5   : > { %2243 = vmatpush2.bf16.msra.mxu1 %v3163_v11  ;;  %v1666_v11 = vrot.slane %v476_v8, %v3738_v9 }
 0x2f6   : > { %2244 = vmatprep.subr.bf16.mxu1 %v3171_v14  ;;  %v1678_v14 = vrot.slane %v476_v8, %v1677_v10 }
 0x2f9   : > { %2245 = vmatpush2.bf16.msra.mxu1 %v3169_v15 }
 0x2fa   : > { %2246 = vmatprep.subr.bf16.mxu1 %v3177_v18 }
 0x2fd   : > { %2247 = vmatpush2.bf16.msra.mxu1 %v3175_v19 }
 0x380   : > { %v1551_v22 = vpop.f32.mrf.mxu1 }
 0x381   : > { %v1552_v29 = vadd.f32 %v1551_v22, %v1430_v24 }
 0x382   : > { %v1553_v25 = vpop.f32.mrf.mxu1 }
 0x383   : > { %v1554_v27 = vadd.f32 %v1553_v25, %v1434_v23  ;;  %v1560_v35 = vmax.f32 %v1552_v29, 0.0  ;;  %v1681_v29 = vsub.s32 4, %v3729_v4 }
 0x384   : > { %v1555_v26 = vpop.f32.mrf.mxu1 }
 0x385   : > { %v1556_v28 = vadd.f32 %v1555_v26, %v1430_v24  ;;  %v1561_v33 = vmax.f32 %v1554_v27, 0.0 }
 0x386   : > { %v1557_v30 = vpop.f32.mrf.mxu1 }
 0x387   : > { %v1558_v31 = vadd.f32 %v1557_v30, %v1434_v23  ;;  %v1562_v32 = vmax.f32 %v1556_v28, 0.0  ;;  %v1685_v30 = vsub.s32 5, %v3729_v4 }
 0x389   : > { %v1563_v34 = vmax.f32 %v1558_v31, 0.0  ;;  %v3756_v38 = vpack.c.bf16 %v1562_v32, %v1560_v35  ;;  %v1682_v31 = vrot.slane %v476_v8, %v1681_v29  ;;  %v1686_v32 = vrot.slane %v476_v8, %v1685_v30 }
 0x38b   : > { %v1565_v36 = vpack.c.bf16 %v1563_v34, %v1561_v33 }
 0x38d   : > { %2205 = vmatprep.mubr.bf16.mxu0 %v1565_v36  ;;  %2248 = vmatprep.mubr.bf16.mxu1 %v1565_v36 }
 0x38e   : > { %2206 = vmatmul.mubr.bf16.vlgmr.msra.gmra.mxu0 %v3756_v38  ;;  %2249 = vmatmul.mubr.bf16.vlgmr.msra.gmra.mxu1 %v3756_v38 }
 0x38f   : > { %2260 = vmatpush1.bf16.msra.mxu0 %v3178_v37  ;;  %2291 = vmatprep.mubr.bf16.mxu0 %v1565_v36 }
 0x390   : > { %2261 = vmatprep.subr.bf16.mxu0 %v3183_v39 }
 0x393   : > { %2262 = vmatpush1.bf16.msra.mxu0 %v3181_v40 }
 0x394   : > { %2263 = vmatprep.subr.bf16.mxu0 %v3186_v41 }
 0x397   : > { %2264 = vmatpush1.bf16.msra.mxu0 %v3184_v42 }
 0x398   : > { %2265 = vmatprep.subr.bf16.mxu0 %v3189_v43 }
 0x39b   : > { %2266 = vmatpush1.bf16.msra.mxu0 %v3187_v44 }
 0x39c   : > { %2267 = vmatprep.subr.bf16.mxu0 %v3192_v45 }
 0x39f   : > { %2268 = vmatpush1.bf16.msra.mxu0 %v3190_v46 }
 0x3a0   : > { %2269 = vmatprep.subr.bf16.mxu0 %v3195_v2 }
 0x3a3   : > { %2270 = vmatpush1.bf16.msra.mxu0 %v3193_v47 }
 0x3a4   : > { %2271 = vmatprep.subr.bf16.mxu0 %v3198_v48 }
 0x3a7   : > { %2272 = vmatpush1.bf16.msra.mxu0 %v3196_v49 }
 0x3a8   : > { %2273 = vmatprep.subr.bf16.mxu0 %v3201_v50 }
 0x3ab   : > { %2274 = vmatpush1.bf16.msra.mxu0 %v3199_v51 }
 0x3ac   : > { %2275 = vmatprep.subr.bf16.mxu0 %v3204_v52 }
 0x3af   : > { %2276 = vmatpush2.bf16.msra.mxu0 %v3202_v53 }
 0x3b0   : > { %2277 = vmatprep.subr.bf16.mxu0 %v3207_v54 }
 0x3b3   : > { %2278 = vmatpush2.bf16.msra.mxu0 %v3205_v55 }
 0x3b4   : > { %2279 = vmatprep.subr.bf16.mxu0 %v3210_v56 }
 0x3b7   : > { %2280 = vmatpush2.bf16.msra.mxu0 %v3208_v57 }
 0x3b8   : > { %2281 = vmatprep.subr.bf16.mxu0 %v3213_v58 }
 0x3bb   : > { %2282 = vmatpush2.bf16.msra.mxu0 %v3211_v59 }
 0x3bc   : > { %2283 = vmatprep.subr.bf16.mxu0 %v3216_v60 }
 0x3bf   : > { %2284 = vmatpush2.bf16.msra.mxu0 %v3214_v61 }
 0x3c0   : > { %2285 = vmatprep.subr.bf16.mxu0 %v3219_v62 }
 0x3c3   : > { %2286 = vmatpush2.bf16.msra.mxu0 %v3217_v63 }
 0x3c4   : > { %2287 = vmatprep.subr.bf16.mxu0 %v3222_v0 }
 0x3c7   : > { %2288 = vmatpush2.bf16.msra.mxu0 %v3220_v1 }
 0x3c8   : > { %2289 = vmatprep.subr.bf16.mxu0 %v3225_v3 }
 0x3cb   : > { %2290 = vmatpush2.bf16.msra.mxu0 %v3223_v5 }
 0x3ce   : > { %2292 = vmatmul.mubr.bf16.vlgmr.msra.gmra.mxu0 %v3756_v38 }
 0x44e   : > { %v2207_v15 = vpop.f32.mrf.mxu0  ;;  %v2250_v16 = vpop.f32.mrf.mxu1 }
 0x44f   : > { %v2208_v17 = vadd.f32 %v2207_v15, %v1666_v11  ;;  %v2251_v18 = vadd.f32 %v2250_v16, %v1674_v12 }
 0x450   : > { %v2209_v19 = vpop.f32.mrf.mxu0  ;;  %v2252_v20 = vpop.f32.mrf.mxu1 }
 0x451   : > { %2304 = vst [vmem:[%s3770_s22] sm:$0xff] %v2208_v17  ;;  %2306 = vst [vmem:[%s3770_s22 + $0x10] sm:$0xff] %v2251_v18  ;;  %v2210_v7 = vadd.f32 %v2209_v19, %v1670_v13  ;;  %v2253_v9 = vadd.f32 %v2252_v20, %v1678_v14 }
 0x452   : > { %v2211_v21 = vpop.f32.mrf.mxu0  ;;  %v2254_v22 = vpop.f32.mrf.mxu1 }
 0x453   : > { %2305 = vst [vmem:[%s3770_s22 + $0x8] sm:$0xff] %v2210_v7  ;;  %2307 = vst [vmem:[%s3770_s22 + $0x18] sm:$0xff] %v2253_v9  ;;  %v2212_v23 = vadd.f32 %v2211_v21, %v1666_v11  ;;  %v2255_v24 = vadd.f32 %v2254_v22, %v1674_v12 }
 0x454   : > { %v2213_v25 = vpop.f32.mrf.mxu0  ;;  %v2256_v26 = vpop.f32.mrf.mxu1 }
 0x455   : > { %2310 = vst [vmem:[%s3770_s22 + $0x30] sm:$0xff] %v2212_v23  ;;  %2312 = vst [vmem:[%s3770_s22 + $0x40] sm:$0xff] %v2255_v24  ;;  %v2214_v27 = vadd.f32 %v2213_v25, %v1670_v13  ;;  %v2257_v28 = vadd.f32 %v2256_v26, %v1678_v14 }
 0x457   : > { %2311 = vst [vmem:[%s3770_s22 + $0x38] sm:$0xff] %v2214_v27  ;;  %2313 = vst [vmem:[%s3770_s22 + $0x48] sm:$0xff] %v2257_v28 }
 0x48e   : > { %v2293_v33 = vpop.f32.mrf.mxu0 }
 0x48f   : > { %v2294_v34 = vadd.f32 %v2293_v33, %v1682_v31 }
 0x490   : > { %v2295_v35 = vpop.f32.mrf.mxu0 }
 0x491   : > { %2308 = vst [vmem:[%s3770_s22 + $0x20] sm:$0xff] %v2294_v34  ;;  %v2296_v36 = vadd.f32 %v2295_v35, %v1686_v32 }
 0x492   : > { %v2297_v37 = vpop.f32.mrf.mxu0 }
 0x493   : > { %2309 = vst [vmem:[%s3770_s22 + $0x28] sm:$0xff] %v2296_v36  ;;  %v2298_v38 = vadd.f32 %v2297_v37, %v1682_v31  ;;  %2328 = sbr.rel (!%p3923_p12) target bundleno = 1203 (0x4b3), region = 80 }
 0x494   : > { %v2299_v39 = vpop.f32.mrf.mxu0 }
 0x495   : > { %2314 = vst [vmem:[%s3770_s22 + $0x50] sm:$0xff] %v2298_v38  ;;  %v2300_v40 = vadd.f32 %v2299_v39, %v1686_v32 }
 0x497   : > { %2315 = vst [vmem:[%s3770_s22 + $0x58] sm:$0xff] %v2300_v40 }
 0x498   : > { %s3934_s24 = smov (!%p2331_p8, %s2330_s24), 2 }
 0x499   : > { %s3791_s27 = sshll.u32 %s3934_s24, 7 }
 0x49a   : > { %s2335_s28 = ssub.s32 256, %s3791_s27 }
 0x49b   : > { %2336 = vsyncadd %s2317_s30, %s2335_s28  ;;  %p2761_p4 = scmp.ne.s32.totalorder %s3791_s27, 0  ;;  %s2774_s12 = sshll.u32 %s3564_s17, 8 }
 0x49c   : > { %s3801_s29 = scalar_lea.hbm %s3900_s9, %s2774_s12  ;;  %s2341_s20 = sshll.u32 %s3747_s19, 4  ;;  %s3804_s20 = int_to_ptr.vmem [resolvable:$true] %s2341_s20 }
 0x49d   : > { %s3364_s3 = scalar_lea.vmem %s3804_s20, %s3791_s27  ;;  %s3482_s23 = smov [#allocation11]  }
 0x49e   : > { %p3365_p10 = scmp.ne.s32.totalorder %s3804_s20, %s3364_s3  ;;  %s3368_s24 = sshll.u32 %s3482_s23, 4  ;;  %s3369_s24 = int_to_ptr.vmem [resolvable:$false] %s3368_s24 }
 0x49f   : > { %s3370_s28 = scalar_lea.vmem %s3369_s24, 512  ;;  %p3371_p0 = scmp.lt.s32.totalorder %s3804_s20, %s3369_s24 }
 0x4a0   : > { %p3366_p1 = pnand %p3365_p10, %p2761_p4  ;;  %p3372_p2 = scmp.lt.s32.totalorder %s3370_s28, %s3364_s3 }
 0x4a2   : > { %p3367_p6 = pneg %p3366_p1  ;;  %p3373_p11 = por %p3372_p2, %p3371_p0 }
 0x4a4   : > { %p3374_p3 = pnand %p3373_p11, %p3367_p6 }
 0x4a6   : > { %3377 = shalt.err (!%p3374_p3)
}
 0x4a7   : > { %s3378_s19 = scalar_lea.hbm %s3801_s29, %s3791_s27  ;;  %s3382_s11 = scalar_lea.hbm %s3900_s9, 640 }
 0x4a8   : > { %p3379_p5 = scmp.ne.s32.totalorder %s3801_s29, %s3378_s19  ;;  %p3383_p9 = scmp.lt.s32.totalorder %s3801_s29, %s3900_s9 }
 0x4a9   : > { %p3384_p12 = scmp.lt.s32.totalorder %s3382_s11, %s3378_s19 }
 0x4aa   : > { %p3380_p13 = pnand %p3379_p5, %p2761_p4 }
 0x4ab   : > { %p3385_p8 = por %p3384_p12, %p3383_p9 }
 0x4ac   : > { %p3381_p7 = pneg %p3380_p13 }
 0x4ae   : > { %p3386_p10 = pnand %p3385_p8, %p3381_p7 }
 0x4b0   : > { %3389 = shalt.err (!%p3386_p10)
}
 0x4b1   : > { %s3483_s3 = smov 128   ;;  %s3484_s28 = smov 8  }
 0x4b2   : > { %2347 = dma.vmem_to_hbm [thread:$0]  (%p2761_p4), %s3804_s20, %s3791_s27, %s3801_s29, %s2317_s30, %s3483_s3, %s3483_s3, %s3484_s28  }
 0x4b3 PF: > { %p3924_p1 = scmp.ne.s32.totalorder %s3912_s25, 0 }
 0x4b4   : > { %s2765_s19 = sshll.u32 (%p3924_p1), %s3564_s17, 1 }
 0x4b5   : > { %2350 = sbr.rel (!%p3924_p1) target bundleno = 1238 (0x4d6), region = 84  ;;  %s2352_s12 = ssub.s32 (%p3924_p1), 5, %s2765_s19 }
 0x4b6   : > { %p2353_p6 = scmp.lt.s32.totalorder (%p3924_p1), %s2352_s12, 2 }
 0x4ba   : > { %s3936_s12 = smov (!%p2353_p6, %s2352_s12), 2 }
 0x4bb   : > { %s3834_s18 = smul.u32 768, %s3936_s12 }
 0x4bd   : > { %s2358_s11 = ssub.s32 1536, %s3834_s18 }
 0x4be   : > { %2359 = vsyncadd %s2322_s1, %s2358_s11  ;;  %p2768_p4 = scmp.ne.s32.totalorder %s3834_s18, 0  ;;  %s2800_s25 = smul.u32 1536, %s3564_s17 }
 0x4bf   : > { %s2365_s30 = sshll.u32 %s3770_s22, 4  ;;  %s3485_s24 = smov [#allocation12]   ;;  %s3847_s30 = int_to_ptr.vmem [resolvable:$true] %s2365_s30 }
 0x4c0   : > { %s3845_s20 = scalar_lea.hbm %s3901_s10, %s2800_s25  ;;  %s3390_s23 = scalar_lea.vmem %s3847_s30, %s3834_s18 }
 0x4c1   : > { %p3391_p0 = scmp.ne.s32.totalorder %s3847_s30, %s3390_s23  ;;  %s3394_s3 = sshll.u32 %s3485_s24, 4  ;;  %s3395_s3 = int_to_ptr.vmem [resolvable:$false] %s3394_s3 }
 0x4c2   : > { %s3396_s17 = scalar_lea.vmem %s3395_s3, 3072  ;;  %p3397_p3 = scmp.lt.s32.totalorder %s3847_s30, %s3395_s3 }
 0x4c3   : > { %p3392_p2 = pnand %p3391_p0, %p2768_p4  ;;  %p3398_p5 = scmp.lt.s32.totalorder %s3396_s17, %s3390_s23 }
 0x4c5   : > { %p3393_p11 = pneg %p3392_p2  ;;  %p3399_p13 = por %p3398_p5, %p3397_p3 }
 0x4c7   : > { %p3400_p7 = pnand %p3399_p13, %p3393_p11 }
 0x4c9   : > { %3403 = shalt.err (!%p3400_p7)
}
 0x4ca   : > { %s3404_s22 = scalar_lea.hbm %s3845_s20, %s3834_s18  ;;  %s3408_s12 = scalar_lea.hbm %s3901_s10, 3840 }
 0x4cb   : > { %p3405_p9 = scmp.ne.s32.totalorder %s3845_s20, %s3404_s22  ;;  %p3409_p10 = scmp.lt.s32.totalorder %s3845_s20, %s3901_s10 }
 0x4cc   : > { %p3410_p1 = scmp.lt.s32.totalorder %s3408_s12, %s3404_s22 }
 0x4cd   : > { %p3406_p12 = pnand %p3405_p9, %p2768_p4 }
 0x4ce   : > { %p3411_p6 = por %p3410_p1, %p3409_p10 }
 0x4cf   : > { %p3407_p8 = pneg %p3406_p12 }
 0x4d1   : > { %p3412_p0 = pnand %p3411_p6, %p3407_p8 }
 0x4d3   : > { %3415 = shalt.err (!%p3412_p0)
}
 0x4d4   : > { %s3486_s27 = smov 768   ;;  %s3487_s29 = smov 48  }
 0x4d5   : > { %2371 = dma.vmem_to_hbm [thread:$0]  (%p2768_p4), %s3847_s30, %s3834_s18, %s3845_s20, %s2322_s1, %s3486_s27, %s3486_s27, %s3487_s29  }
 0x4d6 PF: > { %p2848_p2 = scmp.ge.s32.totalorder %s3466_s16, 2  ;;  %s2380_s23 = sand.u32 1, %s3454_s13  }
 0x4d7   : > { %p3925_p11 = scmp.ne.s32.totalorder %s3913_s26, 0  ;;  %s2381_s24 = scalar_lea.sflag [#allocation4], %s2380_s23 }
 0x4d9   : > { %p2834_p3 = pnand %p2848_p2, %p3925_p11 }
 0x4db   : > { %p2835_p5 = pneg %p2834_p3 }
 0x4dd   : > { %3445 = dma.done.wait (%p2835_p5), %s2381_s24, 256  }
 0x4de   : > { %3447 = vsyncadd (%p2835_p5), %s2381_s24, 4294967040  ;;  %s2390_s3 = scalar_lea.sflag [#allocation13], %s2380_s23 }
 0x4df   : > { %3449 = dma.done.wait (%p2835_p5), %s2390_s3, 1536  }
 0x4e0   : > { %3451 = vsyncadd (%p2835_p5), %s2390_s3, 4294965760  ;;  %s3926_s16 = sld [smem:[#allocation19_spill]]  ;;  %s3928_s13 = smov %s3458_s14 }
 0x4e1   : > { %s3927_s21 = sld [smem:[#allocation20_spill]]  ;;  %s3929_s14 = smov %s3462_s15 }
 0x4e6   : > { %p29_p4 = scmp.ge.s32.totalorder %s3926_s16, 5  }
 0x4e7   : > { %s3930_s15 = smov %s3927_s21 }
 0x4e8   :  { %31 = sbr.rel (!%p29_p4) target bundleno = 12 (0xc), region = 134 }
 0x4ed   :  { %2395 = vsyncpa [#allocation3], 1 }
 0x4ee   :  { %2397 = vsyncpa [#allocation3 + $0x1], 1 }
 0x4ef   :  { %2398 = vsyncpa [#allocation6], 1 }
 0x4f0   :  { %2399 = vsyncpa [#allocation9], 1 }
 0x4f1   :  { %2400 = vsyncpa [#allocation4], 1 }
 0x4f2   :  { %2402 = vsyncpa [#allocation4 + $0x1], 1 }
 0x4f3   :  { %2403 = vsyncpa [#allocation13], 1 }
 0x4f4   :  { %2405 = vsyncpa [#allocation13 + $0x1], 1 }

</bundles_post_ra>
